<compile_context>
chip_gen: v5e
topology: v5e:2x2
jax: 0.10.0
libtpu: 0.0.40
codegen_flags: <defaults>
</compile_context>

<pallas_src>
import functools
import math

import jax
import jax.numpy as jnp
from jax.experimental import pallas as pl
from jax.experimental.pallas import tpu as pltpu

_BN_EVAL_SCALE = 1.0 / math.sqrt(1.0 + 1e-5)   # BatchNorm1d eval: gamma=1, beta=0, mu=0, var=1
_VMEM_LIMIT = 48 * 1024 * 1024                 # safe on v7x (64 MiB VMEM), > v5e/v6e scoped defaults
_N_TILE_POOL = 4096                            # f32 streaming reductions: ~2 MiB per (tile, 128) block
_N_TILE_VLAD = 1024                            # bf16 VLAD x blocks: <= 256 KiB per block
_DK_TILE = 8192                                # head contraction tile (bf16 weights -> 2 MiB slab)


def _pick_point_tile(npad, target, align=8):
    """Full extent if it fits; else the multiple of `align` in [target/2, target] minimizing
    boundary-tile waste ceil(npad/t)*t - npad (largest tile wins ties)."""
    if npad <= target:
        return npad
    hi = (target // align) * align
    lo = max(align, (target // 2 // align) * align)
    best_t, best_waste = hi, None
    t = hi
    while t >= lo:
        waste = (-npad) % t
        if best_waste is None or waste < best_waste:
            best_t, best_waste = t, waste
        t -= align
    return best_t


def _choose_divisor_tile(total, target, align):
    """Largest multiple of `align` that is <= target and divides `total`, else `total`."""
    t = min(total, target)
    t = (t // align) * align
    while t >= align:
        if total % t == 0:
            return t
        t -= align
    return total


# ----------------------------------------------------------------------------
# MAC / SPoC / GeM : masked per-batch global pooling (point dim tiled as reduction axis)
# ----------------------------------------------------------------------------
def _pool_kernel(len_ref, x_ref, o_ref, acc_ref, *, mode, p, eps, tile_n):
    b = pl.program_id(0)
    t = pl.program_id(1)
    nt = pl.num_programs(1)
    n = len_ref[b]                                         # valid point count for this batch

    @pl.when(t == 0)
    def _init():
        if mode == "MAC":
            acc_ref[...] = jnp.full_like(acc_ref, -jnp.inf)
        else:
            acc_ref[...] = jnp.zeros_like(acc_ref)

    x = x_ref[0]                                           # (TN, C) f32
    # mask rows >= n; also kills Pallas boundary-padded rows (n <= Npad always)
    row = jax.lax.broadcasted_iota(jnp.int32, (tile_n, 1), 0) + t * tile_n
    mask = row < n

    if mode == "MAC":
        acc_ref[...] = jnp.maximum(
            acc_ref[...],
            jnp.max(jnp.where(mask, x, -jnp.inf), axis=0, keepdims=True))
    elif mode == "SPoC":
        acc_ref[...] += jnp.sum(jnp.where(mask, x, 0.0), axis=0, keepdims=True)
    elif mode == "GeM":
        xc = jnp.maximum(x, eps)
        if p == 3.0:
            xx = xc * xc * xc          # two VPU multiplies instead of an EUP pow over the tile
        else:
            xx = jnp.power(xc, p)
        acc_ref[...] += jnp.sum(jnp.where(mask, xx, 0.0), axis=0, keepdims=True)
    else:
        raise NotImplementedError(mode)

    @pl.when(t == nt - 1)
    def _finalize():
        acc = acc_ref[...]
        nf = jnp.maximum(n, 1).astype(jnp.float32)          # guard against empty batch
        if mode == "MAC":
            r = jnp.where(n > 0, acc, 0.0)                  # empty batch -> 0, not -inf
        elif mode == "SPoC":
            r = acc / nf
        else:  # GeM: fractional power only on the reduced (1, C) result
            r = jnp.power(acc / nf, 1.0 / p)
        o_ref[...] = r[None]                                # (1, 1, C)


def _global_pool(x_padded, lengths, mode, p=3.0, eps=1e-6):
    B, Npad, C = x_padded.shape
    tile_n = _pick_point_tile(Npad, _N_TILE_POOL)
    nt = pl.cdiv(Npad, tile_n)
    kernel = functools.partial(_pool_kernel, mode=mode, p=float(p), eps=float(eps), tile_n=tile_n)
    out = pl.pallas_call(
        kernel,
        out_shape=jax.ShapeDtypeStruct((B, 1, C), jnp.float32),
        grid_spec=pltpu.PrefetchScalarGridSpec(
            num_scalar_prefetch=1,
            grid=(B, nt),
            in_specs=[pl.BlockSpec((1, tile_n, C), lambda b, t, lens: (b, t, 0))],
            out_specs=pl.BlockSpec((1, 1, C), lambda b, t, lens: (b, 0, 0)),
            scratch_shapes=[pltpu.VMEM((1, C), jnp.float32)],
        ),
        compiler_params=pltpu.CompilerParams(
            dimension_semantics=("parallel", "arbitrary"),
            vmem_limit_bytes=_VMEM_LIMIT),
    )(lengths, x_padded)
    return out.reshape(B, C)


# ----------------------------------------------------------------------------
# NetVLADLoupe : per-batch VLAD kernel (lane-dense (K, D) output, point dim tiled)
# ----------------------------------------------------------------------------
def _vlad_kernel(x_ref, wc_ref, wc2t_ref, o_ref, vlad_acc, asum_acc, *, tile_n, npad, k):
    t = pl.program_id(1)
    nt = pl.num_programs(1)

    @pl.when(t == 0)
    def _init():
        vlad_acc[...] = jnp.zeros_like(vlad_acc)
        asum_acc[...] = jnp.zeros_like(asum_acc)

    x = x_ref[0]                                            # (TN, D), bf16 by contract
    needs_mask = (npad % tile_n) != 0                       # only mask Pallas boundary rows;
    if needs_mask:                                          # zero-padded rows < Npad participate
        row = jax.lax.broadcasted_iota(jnp.int32, (tile_n, 1), 0) + t * tile_n
        valid = row < npad
        x = jnp.where(valid, x, 0.0)

    xb = x.astype(jnp.bfloat16)                             # no-op when x already arrives bf16
    # soft assignment: bn1(x @ Wc) -> softmax over clusters (per row)
    act = jnp.dot(xb, wc_ref[...], preferred_element_type=jnp.float32)   # (TN, K) f32
    act = act * _BN_EVAL_SCALE
    act = act - jnp.max(act, axis=-1, keepdims=True)
    act = jnp.exp(act)
    # row normalization on the EUP (approx vrcp), keeps VPU off the critical path
    act = act * pl.reciprocal(jnp.sum(act, axis=-1, keepdims=True), approx=True)
    if needs_mask:
        act = jnp.where(valid, act, 0.0)                    # boundary rows must not contribute

    asum_acc[...] += jnp.sum(act, axis=0, keepdims=True)    # (1, K)
    # vlad_t += act^T @ x (contract over points) -> lane-dense (K, D) accumulator
    vlad_acc[...] += jax.lax.dot_general(
        act.astype(jnp.bfloat16), xb, (((0,), (0,)), ((), ())),
        preferred_element_type=jnp.float32)

    @pl.when(t == nt - 1)
    def _finalize():
        asum = asum_acc[...]                                 # (1, K)
        wc2 = wc2t_ref[...].astype(jnp.float32)              # (K, D)
        # a_t[k, d] = asum[k] * wc2t[k, d]  ==  diag(asum) @ wc2t  (avoids a tiny transpose)
        rr = jax.lax.broadcasted_iota(jnp.int32, (k, k), 0)
        cc = jax.lax.broadcasted_iota(jnp.int32, (k, k), 1)
        diag = jnp.where(rr == cc, jnp.broadcast_to(asum, (k, k)), 0.0)
        a_t = jnp.dot(diag, wc2, preferred_element_type=jnp.float32)     # (K, D)
        vlad = vlad_acc[...] - a_t
        # intra-normalization over the feature dim D (torch F.normalize(vlad, dim=1)) via EUP rsqrt
        vlad = vlad * jax.lax.rsqrt(
            jnp.maximum(jnp.sum(vlad * vlad, axis=-1, keepdims=True), 1e-24))
        # global L2 normalization over the flattened (K*D) descriptor
        vlad = vlad * jax.lax.rsqrt(jnp.maximum(jnp.sum(vlad * vlad), 1e-24))
        o_ref[...] = vlad[None]                              # (1, K, D)


def _vlad_pallas(x_padded, wc, wc2t):
    B, Npad, D = x_padded.shape
    K = wc.shape[1]
    tile_n = _pick_point_tile(Npad, _N_TILE_VLAD)
    nt = pl.cdiv(Npad, tile_n)
    kernel = functools.partial(_vlad_kernel, tile_n=tile_n, npad=Npad, k=K)
    return pl.pallas_call(
        kernel,
        out_shape=jax.ShapeDtypeStruct((B, K, D), jnp.float32),
        grid=(B, nt),
        in_specs=[
            pl.BlockSpec((1, tile_n, D), lambda b, t: (b, t, 0)),
            pl.BlockSpec((D, K), lambda b, t: (0, 0)),       # resident bf16 cluster weights
            pl.BlockSpec((K, D), lambda b, t: (0, 0)),       # resident bf16 cluster2^T
        ],
        out_specs=pl.BlockSpec((1, K, D), lambda b, t: (b, 0, 0)),
        scratch_shapes=[pltpu.VMEM((K, D), jnp.float32),
                        pltpu.VMEM((1, K), jnp.float32)],
        compiler_params=pltpu.CompilerParams(
            dimension_semantics=("parallel", "arbitrary"),
            vmem_limit_bytes=_VMEM_LIMIT),
    )(x_padded, wc, wc2t)


# ----------------------------------------------------------------------------
# NetVLAD head : hidden1 projection (contraction tiled) + bn2 + optional context gating
# ----------------------------------------------------------------------------
def _head_kernel(*refs, gating):
    if gating:
        v_ref, w_ref, wg_ref, o_ref, acc_ref = refs
    else:
        v_ref, w_ref, o_ref, acc_ref = refs
    t = pl.program_id(0)

    @pl.when(t == 0)
    def _init():
        acc_ref[...] = jnp.zeros_like(acc_ref)

    acc_ref[...] += jnp.dot(v_ref[...].astype(jnp.bfloat16), w_ref[...],
                            preferred_element_type=jnp.float32)

    @pl.when(t == pl.num_programs(0) - 1)
    def _finalize():
        y = acc_ref[...] * _BN_EVAL_SCALE                    # bn2 (eval)
        if gating:
            g = jnp.dot(y.astype(jnp.bfloat16), wg_ref[...],
                        preferred_element_type=jnp.float32)
            g = jax.nn.sigmoid(g * _BN_EVAL_SCALE)           # gating bn (eval) + sigmoid
            y = y * g
        o_ref[...] = y


def _head_pallas(vlad_flat, w_hidden, w_gating, gating):
    B, DK = vlad_flat.shape
    O = w_hidden.shape[1]
    tdk = _choose_divisor_tile(DK, _DK_TILE, 128)            # bf16 weights -> 1 step for K=64,D=128
    nt = DK // tdk
    in_specs = [
        pl.BlockSpec((B, tdk), lambda t: (0, t)),
        pl.BlockSpec((tdk, O), lambda t: (t, 0)),
    ]
    args = [vlad_flat, w_hidden]
    if gating:                                               # no gating -> no (O, O) DMA at all
        in_specs.append(pl.BlockSpec((O, O), lambda t: (0, 0)))
        args.append(w_gating)
    return pl.pallas_call(
        functools.partial(_head_kernel, gating=gating),
        out_shape=jax.ShapeDtypeStruct((B, O), jnp.float32),
        grid=(nt,),
        in_specs=in_specs,
        out_specs=pl.BlockSpec((B, O), lambda t: (0, 0)),
        scratch_shapes=[pltpu.VMEM((B, O), jnp.float32)],
        compiler_params=pltpu.CompilerParams(
            dimension_semantics=("arbitrary",),
            vmem_limit_bytes=_VMEM_LIMIT),
    )(*args)


# ----------------------------------------------------------------------------
# PoolingWrapper equivalent
# ----------------------------------------------------------------------------
class PoolingWrapperPallas:
    def __init__(self, pool_method, in_dim, output_dim, key=None):
        self.pool_method = pool_method
        self.in_dim = in_dim
        self.output_dim = output_dim
        if pool_method in ("MAC", "SPoC", "GeM"):
            assert in_dim == output_dim
            self.p = 3.0      # GeM p parameter (torch.ones(1) * 3)
            self.eps = 1e-6
        elif pool_method in ("netvlad", "netvladgc"):
            self.gating = pool_method == "netvladgc"
            self.cluster_size = 64
            K, D, O = self.cluster_size, in_dim, output_dim
            k1, k2, k3, k4 = jax.random.split(key, 4)
            s = 1.0 / math.sqrt(D)
            wc = jax.random.normal(k1, (D, K), jnp.float32) * s
            wc2 = jax.random.normal(k2, (D, K), jnp.float32) * s                 # torch layout
            w_torch = jax.random.normal(k3, (D * K, O), jnp.float32) * s
            wg = jax.random.normal(k4, (O, O), jnp.float32) * (1.0 / math.sqrt(O))
            # Kernel weights stored bf16 ONCE at init (weight streams dominate the DMA cost).
            self.cluster_weights = wc.astype(jnp.bfloat16)                       # (D, K)
            self.cluster_weights2_t = jnp.transpose(wc2).astype(jnp.bfloat16)    # (K, D) lane-dense
            # torch flattens vlad (B, D, K) as d*K + k; the kernel produces lane-dense (B, K, D)
            # flattened as k*D + d -> permute hidden1 rows ONCE so results match torch exactly.
            self.hidden1_weights = (w_torch.reshape(D, K, O).transpose(1, 0, 2)
                                    .reshape(K * D, O).astype(jnp.bfloat16))
            self.gating_weights = wg.astype(jnp.bfloat16)                        # (O, O)
            # f32 copies of the bf16-rounded params in torch layout (reference / checking only)
            self.cluster_weights_f32 = self.cluster_weights.astype(jnp.float32)
            self.cluster_weights2_f32 = jnp.transpose(self.cluster_weights2_t.astype(jnp.float32))
            self.hidden1_weights_torch_f32 = w_torch.astype(jnp.bfloat16).astype(jnp.float32)
            self.gating_weights_f32 = self.gating_weights.astype(jnp.float32)
        else:
            raise NotImplementedError("Unknown pooling method: {}".format(pool_method))

    def __call__(self, x_padded, lengths):
        if self.pool_method in ("MAC", "SPoC", "GeM"):
            return _global_pool(x_padded, lengths, self.pool_method, self.p, self.eps)
        # netvlad path: zero-padded rows deliberately participate (pad_sequence semantics ->
        # NetVLADLoupe does not mask padding), so lengths are unused here. x_padded should arrive
        # in bf16 (cast fused upstream); f32 inputs also work, just at 2x the DMA cost.
        B, Npad, D = x_padded.shape
        assert D == self.in_dim
        vlad_t = _vlad_pallas(x_padded, self.cluster_weights, self.cluster_weights2_t)  # (B, K, D)
        vlad_flat = vlad_t.reshape(B, self.cluster_size * D)
        out = _head_pallas(vlad_flat, self.hidden1_weights,
                           self.gating_weights if self.gating else None, self.gating)
        assert out.shape == (B, self.output_dim)
        return out


# ----------------------------------------------------------------------------
# Pure-JAX references (torch math, f32) for correctness checks
# ----------------------------------------------------------------------------
def _ref_pool(x, lengths, mode, p=3.0, eps=1e-6):
    B, N, C = x.shape
    row = jnp.arange(N)[None, :, None]
    mask = row < lengths[:, None, None]
    nf = jnp.maximum(lengths, 1).astype(jnp.float32)[:, None]
    if mode == "MAC":
        r = jnp.max(jnp.where(mask, x, -jnp.inf), axis=1)
        return jnp.where(lengths[:, None] > 0, r, 0.0)
    if mode == "SPoC":
        return jnp.sum(jnp.where(mask, x, 0.0), axis=1) / nf
    xx = jnp.power(jnp.maximum(x, eps), p)
    return jnp.power(jnp.sum(jnp.where(mask, xx, 0.0), axis=1) / nf, 1.0 / p)


def _ref_netvlad(x, pool):
    B, N, D = x.shape
    K = pool.cluster_size
    act = jnp.einsum("bnd,dk->bnk", x, pool.cluster_weights_f32) * _BN_EVAL_SCALE
    act = jax.nn.softmax(act, axis=-1)
    a = jnp.sum(act, axis=1, keepdims=True) * pool.cluster_weights2_f32[None]     # (B, D, K)
    vlad = jnp.einsum("bnk,bnd->bdk", act, x) - a                                 # (B, D, K)
    vlad = vlad / jnp.maximum(jnp.linalg.norm(vlad, axis=1, keepdims=True), 1e-12)
    vlad = vlad.reshape(B, D * K)
    vlad = vlad / jnp.maximum(jnp.linalg.norm(vlad, axis=-1, keepdims=True), 1e-12)
    y = (vlad @ pool.hidden1_weights_torch_f32) * _BN_EVAL_SCALE
    if pool.gating:
        y = y * jax.nn.sigmoid((y @ pool.gating_weights_f32) * _BN_EVAL_SCALE)
    return y


if __name__ == "__main__":
    key = jax.random.PRNGKey(0)
    kx, kp = jax.random.split(key)

    # Npad > _N_TILE_VLAD so the point-dim reduction tiling (incl. boundary masks) is exercised.
    B, Npad, C = 2, 1500, 128
    lengths = jnp.array([1500, 1100], dtype=jnp.int32)       # max(lengths) == Npad (pad_sequence)
    x = jax.random.normal(kx, (B, Npad, C), jnp.float32)
    row = jnp.arange(Npad)[None, :, None]
    x = jnp.where(row < lengths[:, None, None], x, 0.0)      # zero-pad invalid rows

    # MAC / SPoC / GeM (pure f32 path)
    for method in ("MAC", "SPoC", "GeM"):
        pool = PoolingWrapperPallas(method, C, C, key=kp)
        y = jax.block_until_ready(pool(x, lengths))
        y_ref = _ref_pool(x, lengths, method, p=3.0, eps=1e-6)
        assert y.shape == (B, C), (method, y.shape)
        assert bool(jnp.all(jnp.isfinite(y))), method
        assert bool(jnp.allclose(y, y_ref, rtol=1e-4, atol=1e-4)), (
            method, float(jnp.max(jnp.abs(y - y_ref))))

    # netvlad / netvladgc: point features arrive in bf16 by contract (the cast is fused into the
    # upstream feature-extractor epilogue; modeled here once in the test harness).
    x_bf16 = x.astype(jnp.bfloat16)
    x_ref_in = x_bf16.astype(jnp.float32)                    # same values the kernel sees
    for method in ("netvlad", "netvladgc"):
        pool = PoolingWrapperPallas(method, C, 128, key=kp)
        y = jax.block_until_ready(pool(x_bf16, lengths))
        y_ref = _ref_netvlad(x_ref_in, pool)
        assert y.shape == (B, 128), (method, y.shape)
        assert bool(jnp.all(jnp.isfinite(y))), method
        assert bool(jnp.allclose(y, y_ref, rtol=5e-2, atol=3e-2)), (
            method, float(jnp.max(jnp.abs(y - y_ref))))

    print("KERNEL_OK")
</pallas_src>

<mosaic_0001>
module attributes {stable_mosaic.version = 11 : i64} {
  func.func @_pool_kernel(%arg0: i32, %arg1: i32, %arg2: memref<2xi32, #tpu.memory_space<smem>>, %arg3: memref<1x1500x128xf32, #tpu.memory_space<vmem>>, %arg4: memref<1x1x128xf32, #tpu.memory_space<vmem>>, %arg5: memref<1x128xf32, #tpu.memory_space<vmem>>) attributes {dimension_semantics = [#tpu.dimension_semantics<parallel>, #tpu.dimension_semantics<arbitrary>], iteration_bounds = array<i64: 2, 1>, scalar_prefetch = 1 : i64, scratch_operands = 1 : i64, tpu.core_type = #tpu.core_type<tc>, window_params = [{transform_indices = @transform_0, window_bounds = array<i64: 1, 1500, 128>}, {transform_indices = @transform_1, window_bounds = array<i64: 1, 1, 128>}]} {
    %0 = arith.index_cast %arg0 : i32 to index
    %1 = memref.load %arg2[%0] : memref<2xi32, #tpu.memory_space<smem>>
    %c0_i32 = arith.constant 0 : i32
    %2 = arith.cmpi eq, %arg1, %c0_i32 : i32
    %3 = arith.extui %2 : i1 to i32
    %c0_i32_0 = arith.constant 0 : i32
    %4 = arith.cmpi ne, %3, %c0_i32_0 : i32
    scf.if %4 {
      %cst_10 = arith.constant 0xFF800000 : f32
      %25 = vector.broadcast %cst_10 : f32 to vector<1x128xf32>
      %c0_11 = arith.constant 0 : index
      %c0_12 = arith.constant 0 : index
      %26 = vector.load %arg5[%c0_11, %c0_12] : memref<1x128xf32, #tpu.memory_space<vmem>>, vector<1x128xf32>
      tpu.vector_store %arg5[%c0_11, %c0_12], %25 {strides = array<i32>} : memref<1x128xf32, #tpu.memory_space<vmem>>, vector<1x128xf32>,
    } else {
    }
    %c0 = arith.constant 0 : index
    %c0_1 = arith.constant 0 : index
    %c0_2 = arith.constant 0 : index
    %5 = vector.load %arg3[%c0, %c0_1, %c0_2] : memref<1x1500x128xf32, #tpu.memory_space<vmem>>, vector<1x1500x128xf32>
    %6 = vector.shape_cast %5 : vector<1x1500x128xf32> to vector<1500x128xf32>
    %7 = tpu.iota {dimensions = array<i32: 0>} : vector<1500x1xi32>
    %c1500_i32 = arith.constant 1500 : i32
    %8 = arith.muli %arg1, %c1500_i32 : i32
    %9 = vector.broadcast %8 : i32 to vector<1500x1xi32>
    %10 = arith.addi %7, %9 : vector<1500x1xi32>
    %11 = vector.broadcast %1 : i32 to vector<1500x1xi32>
    %12 = arith.cmpi slt, %10, %11 : vector<1500x1xi32>
    %c0_3 = arith.constant 0 : index
    %c0_4 = arith.constant 0 : index
    %13 = vector.load %arg5[%c0_3, %c0_4] : memref<1x128xf32, #tpu.memory_space<vmem>>, vector<1x128xf32>
    %cst = arith.constant 0xFF800000 : f32
    %14 = vector.shape_cast %12 : vector<1500x1xi1> to vector<1500x1xi1>
    %15 = vector.broadcast %14 : vector<1500x1xi1> to vector<1500x128xi1>
    %16 = vector.broadcast %cst : f32 to vector<1500x128xf32>
    %17 = arith.select %15, %6, %16 : vector<1500x128xi1>, vector<1500x128xf32>
    %cst_5 = arith.constant dense<0xFF800000> : vector<128xf32>
    %18 = vector.multi_reduction <maximumf>, %17, %cst_5 [0] : vector<1500x128xf32> to vector<128xf32>
    %19 = vector.shape_cast %18 : vector<128xf32> to vector<1x128xf32>
    %20 = arith.maximumf %13, %19 : vector<1x128xf32>
    %c0_6 = arith.constant 0 : index
    %c0_7 = arith.constant 0 : index
    %21 = vector.load %arg5[%c0_6, %c0_7] : memref<1x128xf32, #tpu.memory_space<vmem>>, vector<1x128xf32>
    tpu.vector_store %arg5[%c0_6, %c0_7], %20 {strides = array<i32>} : memref<1x128xf32, #tpu.memory_space<vmem>>, vector<1x128xf32>,
    %c0_i32_8 = arith.constant 0 : i32
    %22 = arith.cmpi eq, %arg1, %c0_i32_8 : i32
    %23 = arith.extui %22 : i1 to i32
    %c0_i32_9 = arith.constant 0 : i32
    %24 = arith.cmpi ne, %23, %c0_i32_9 : i32
    scf.if %24 {
      %c0_10 = arith.constant 0 : index
      %c0_11 = arith.constant 0 : index
      %25 = vector.load %arg5[%c0_10, %c0_11] : memref<1x128xf32, #tpu.memory_space<vmem>>, vector<1x128xf32>
      %c0_i32_12 = arith.constant 0 : i32
      %26 = arith.cmpi sgt, %1, %c0_i32_12 : i32
      %cst_13 = arith.constant 0.000000e+00 : f32
      %27 = vector.broadcast %cst_13 : f32 to vector<1x128xf32>
      %28 = arith.select %26, %25, %27 : vector<1x128xf32>
      %29 = vector.shape_cast %28 : vector<1x128xf32> to vector<1x1x128xf32>
      %c0_14 = arith.constant 0 : index
      %c0_15 = arith.constant 0 : index
      %c0_16 = arith.constant 0 : index
      %30 = vector.load %arg4[%c0_14, %c0_15, %c0_16] : memref<1x1x128xf32, #tpu.memory_space<vmem>>, vector<1x1x128xf32>
      tpu.vector_store %arg4[%c0_14, %c0_15, %c0_16], %29 {strides = array<i32>} : memref<1x1x128xf32, #tpu.memory_space<vmem>>, vector<1x1x128xf32>,
    } else {
    }
    return
  }
  func.func @transform_0(%arg0: i32, %arg1: i32, %arg2: memref<2xi32, #tpu.memory_space<smem>>) -> (i32, i32, i32) {
    %c0_i32 = arith.constant 0 : i32
    %c0_i32_0 = arith.constant 0 : i32
    return %arg0, %arg1, %c0_i32 : i32, i32, i32
  }
  func.func @transform_1(%arg0: i32, %arg1: i32, %arg2: memref<2xi32, #tpu.memory_space<smem>>) -> (i32, i32, i32) {
    %c0_i32 = arith.constant 0 : i32
    %c0_i32_0 = arith.constant 0 : i32
    %c0_i32_1 = arith.constant 0 : i32
    return %arg0, %c0_i32, %c0_i32_0 : i32, i32, i32
  }
}

</mosaic_0001>

<bundles_post_ra>
// kernel: tpu_custom_call.1
= control target key start
LH: loop header
LB: loop body
LE: loop exit
PB: predicated region body
PF: predicated region fallthrough
CT: control target
= control target key end

     0   :  { %s1927_s12 = smov [#allocation4]   ;;  %s2619_s0 = inlined_call_operand.vmem [shape: s32[2], index: 0, kind: input, shape index: {}]   ;;  %s2620_s1 = inlined_call_operand.vmem [shape: f32[2,1500,128], index: 1, kind: input, shape index: {}]   ;;  %s2621_s2 = inlined_call_operand.hbm [shape: f32[2,1,128], index: 2, kind: output, shape index: {}]  }
   0x1   :  { %s8_s11 = sshll.u32 %s2619_s0, 4  ;;  %s9_s11 = int_to_ptr.vmem [resolvable:$true] %s8_s11 }
   0x2   :  { %11 = dma.vmem_to_smem %s9_s11, 16, %s1927_s12, [#allocation3] }
   0x3   :  { %1897 = dma.done.wait [#allocation3], 16 }
   0x4   :  { %1898 = vsyncadd [#allocation3], 4294967280 }
   0x5   :  { %14 = sfence }
   0x6   :  { %15 = vsyncpa [#allocation6], 0 }
   0x7   :  { %17 = vsyncpa [#allocation6 + $0x1], 0  ;;  %s1947_s13 = smov 0   ;;  %s1949_s14 = smov 0  }
   0x8   :  { %s1951_s15 = smov 0   ;;  %s1953_s16 = smov 0  }
   0x9   :  { %s1955_s17 = smov 0   ;;  %s1957_s18 = smov 0  }
   0xa LB: > { %s1767_s0 = sadd.s32 4294967295, %s1925_s18   ;;  %s1768_s19 = sadd.s32 4294967294, %s1925_s18   ;;  %s1925_s18 = sphi %s1957_s18, %s23_s18   ;;  %s1921_s17 = sphi %s1955_s17, %s2628_s17   ;;  %s1917_s16 = sphi %s1953_s16, %s2627_s16   ;;  %s1913_s15 = sphi %s1951_s15, %s2626_s15   ;;  %s1909_s14 = sphi %s1949_s14, %s2625_s14   ;;  %s1905_s13 = sphi %s1947_s13, %s2624_s13  }
   0xb   : > { %s35_s20 = sadd.s32 1, %s1921_s17  ;;  %s70_s21 = sadd.s32 1, %s1913_s15 }
   0xc   : > { %p37_p0 = scmp.ge.s32.totalorder %s35_s20, 2  ;;  %p80_p1 = scmp.ne.s32.totalorder %s1913_s15, %s1909_s14 }
   0xd   : > { %p81_p2 = scmp.eq.s32.totalorder %s1767_s0, 1  ;;  %p86_p3 = scmp.ne.s32.totalorder %s1909_s14, %s1905_s13 }
   0xe   : > { %s2630_s20 = smov (%p37_p0, %s35_s20), 0  ;;  %p87_p5 = scmp.eq.s32.totalorder %s1768_s19, 1 }
   0xf   : > { %p1987_p4 = por %p81_p2, %p80_p1  ;;  %s67_s23 = ssub.s32 %s1921_s17, %s2630_s20 }
  0x10   : > { %p1771_p6 = scmp.ge.s32.totalorder %s1925_s18, 1  ;;  %p68_p7 = scmp.eq.s32.totalorder %s67_s23, 0 }
  0x11   : > { %p1994_p8 = por %p87_p5, %p86_p3  ;;  %p118_p9 = scmp.lt.s32.totalorder %s1925_s18, 3 }
  0x12   : > { %s2000_s25 = scalar_select %p68_p7, %s1913_s15, %s70_s21  }
  0x13   : > { %p119_p10 = pnand %p1771_p6, %p118_p9 }
  0x14   : > { %p142_p11 = scmp.lt.s32.totalorder (!%p119_p10), %s1917_s16, 1  ;;  %s2004_s26 = sld [smem:[#allocation4 + %s1917_s16]] (!%p119_p10) }
  0x15   : > { %122 = sbr.rel (%p119_p10) target bundleno = 426 (0x1aa), region = 24  ;;  %s139_s4 = sand.u32 (!%p119_p10), 1, %s1909_s14  }
  0x16   : > { %s1694_s8 = scalar_lea.hbm (!%p119_p10), %s2621_s2, %s1917_s16  ;;  %s140_s9 = scalar_lea.vmem (!%p119_p10), [#allocation5], %s139_s4 }
  0x17   : > { %s1696_s10 = sshll.u32 (!%p119_p10), %s140_s9, 4  ;;  %s1698_s11 = sshll.u32 (!%p119_p10), %s1694_s8, 4  ;;  %s1697_s10 = int_to_ptr.vmem [resolvable:$true] %s1696_s10  ;;  %s1699_s11 = int_to_ptr.hbm [resolvable:$true] %s1698_s11 }
  0x18   : > { %s1686_s12 = scalar_lea.sflag (!%p119_p10), [#allocation6], %s139_s4  ;;  %s1859_s0 = sshra.s32 (!%p119_p10), %s1699_s11, 4  ;;  %s1860_s0 = int_to_ptr.hbm [resolvable:$true] %s1859_s0 }
  0x19   : > { %s1861_s19 = scalar_lea.hbm (!%p119_p10), %s1860_s0, 1  ;;  %s1865_s23 = scalar_lea.hbm (!%p119_p10), %s2621_s2, 2 }
  0x1a   : > { %v1928_v0 = vmov -inf   ;;  %v345_v1 = vlaneseq  ;;  %s143_s27 = scalar_select %p142_p11, %s1917_s16, 1  ;;  %v2017_v5 = vstv %s2004_s26 }
  0x1b   : > { %156 = vst [vmem:[#allocation2] sm:$0x1] %v1928_v0  ;;  %p1679_p12 = scmp.gt.s32.totalorder %s2004_s26, 0  ;;  %p1862_p13 = scmp.ne.s32.totalorder %s1860_s0, %s1861_s19 }
  0x1c   : > { %v2007_v2 = vshrl.u32 %v345_v1, 7  ;;  %s1775_s28 = smul.u32 1504, %s143_s27  ;;  %p1866_p2 = scmp.lt.s32.totalorder %s1860_s0, %s2621_s2 }
  0x1d   : > { %s1680_s5 = scalar_select %p1679_p12, 1, 0 }
  0x1e   : > { %v354_v3 = vadd.s32 64, %v2007_v2  ;;  %v355_v4 = vadd.s32 72, %v2007_v2  ;;  %s2014_s3 = scalar_lea.vmem %s2620_s1, %s1775_s28  ;;  %v356_v8 = vadd.s32 80, %v2007_v2  ;;  %v357_v12 = vadd.s32 88, %v2007_v2  ;;  %p1863_p0 = pnand %p1862_p13, %p1987_p4 }
  0x1f   : > { %v165_v6 = vld [vmem:[%s2014_s3 + $0x40] sm:$0xff]  ;;  %v166_v7 = vld [vmem:[%s2014_s3 + $0x48] sm:$0xff]  ;;  %v167_v11 = vld [vmem:[%s2014_s3 + $0x50] sm:$0xff]  ;;  %v358_v16 = vadd.s32 96, %v2007_v2  ;;  %v359_v20 = vadd.s32 104, %v2007_v2  ;;  %v360_v24 = vadd.s32 112, %v2007_v2  ;;  %p1867_p3 = scmp.lt.s32.totalorder %s1865_s23, %s1861_s19 }
  0x20   : > { %vm733_vm0 = vcmp.lt.s32.totalorder %v354_v3, %v2017_v5  ;;  %vm734_vm1 = vcmp.lt.s32.totalorder %v355_v4, %v2017_v5  ;;  %vm735_vm2 = vcmp.lt.s32.totalorder %v356_v8, %v2017_v5  ;;  %v168_v15 = vld [vmem:[%s2014_s3 + $0x58] sm:$0xff]  ;;  %vm736_vm3 = vcmp.lt.s32.totalorder %v357_v12, %v2017_v5  ;;  %v169_v19 = vld [vmem:[%s2014_s3 + $0x60] sm:$0xff]  ;;  %v170_v23 = vld [vmem:[%s2014_s3 + $0x68] sm:$0xff]  ;;  %p1864_p1 = pneg %p1863_p0 }
  0x21   : > { %v1298_v9 = vsel %vm733_vm0, %v165_v6, -inf  ;;  %v1299_v10 = vsel %vm734_vm1, %v166_v7, -inf  ;;  %v1300_v14 = vsel %vm735_vm2, %v167_v11, -inf  ;;  %v1301_v18 = vsel %vm736_vm3, %v168_v15, -inf  ;;  %v171_v27 = vld [vmem:[%s2014_s3 + $0x70] sm:$0xff]  ;;  %v172_v31 = vld [vmem:[%s2014_s3 + $0x78] sm:$0xff]  ;;  %p1868_p5 = por %p1867_p3, %p1866_p2 }
  0x22   : > { %v1482_v13 = vmax.f32 %v1299_v10, %v1298_v9  ;;  %vm737_vm4 = vcmp.lt.s32.totalorder %v358_v16, %v2017_v5  ;;  %vm738_vm5 = vcmp.lt.s32.totalorder %v359_v20, %v2017_v5  ;;  %v361_v28 = vadd.s32 120, %v2007_v2  ;;  %v173_v35 = vld [vmem:[%s2014_s3 + $0x80] sm:$0xff]  ;;  %v174_v39 = vld [vmem:[%s2014_s3 + $0x88] sm:$0xff]  ;;  %v175_v43 = vld [vmem:[%s2014_s3 + $0x90] sm:$0xff] }
  0x23   : > { %v1302_v22 = vsel %vm737_vm4, %v169_v19, -inf  ;;  %v1303_v26 = vsel %vm738_vm5, %v170_v23, -inf  ;;  %vm739_vm6 = vcmp.lt.s32.totalorder %v360_v24, %v2017_v5  ;;  %v362_v32 = vadd.s32 128, %v2007_v2  ;;  %v176_v47 = vld [vmem:[%s2014_s3 + $0x98] sm:$0xff]  ;;  %v177_v51 = vld [vmem:[%s2014_s3 + $0xa0] sm:$0xff]  ;;  %v178_v55 = vld [vmem:[%s2014_s3 + $0xa8] sm:$0xff]  ;;  %p1869_p6 = pnand %p1868_p5, %p1864_p1 }
  0x24   : > { %v1483_v17 = vmax.f32 %v1300_v14, %v1482_v13  ;;  %v1304_v30 = vsel %vm739_vm6, %v171_v27, -inf  ;;  %vm740_vm7 = vcmp.lt.s32.totalorder %v361_v28, %v2017_v5  ;;  %v363_v36 = vadd.s32 136, %v2007_v2  ;;  %v179_v59 = vld [vmem:[%s2014_s3 + $0xb0] sm:$0xff]  ;;  %v180_v63 = vld [vmem:[%s2014_s3 + $0xb8] sm:$0xff]  ;;  %v181_v4 = vld [vmem:[%s2014_s3 + $0xc0] sm:$0xff] }
  0x25   : > { %v1305_v34 = vsel %vm740_vm7, %v172_v31, -inf  ;;  %vm741_vm8 = vcmp.lt.s32.totalorder %v362_v32, %v2017_v5  ;;  %v364_v40 = vadd.s32 144, %v2007_v2  ;;  %v365_v44 = vadd.s32 152, %v2007_v2  ;;  %v182_v9 = vld [vmem:[%s2014_s3 + $0xc8] sm:$0xff]  ;;  %v183_v13 = vld [vmem:[%s2014_s3 + $0xd0] sm:$0xff]  ;;  %v184_v19 = vld [vmem:[%s2014_s3 + $0xd8] sm:$0xff] }
  0x26   : > { %v1484_v21 = vmax.f32 %v1301_v18, %v1483_v17  ;;  %v1306_v38 = vsel %vm741_vm8, %v173_v35, -inf  ;;  %vm742_vm9 = vcmp.lt.s32.totalorder %v363_v36, %v2017_v5  ;;  %v366_v48 = vadd.s32 160, %v2007_v2  ;;  %v185_v20 = vld [vmem:[%s2014_s3 + $0xe0] sm:$0xff]  ;;  %v187_v27 = vld [vmem:[%s2014_s3 + $0xf0] sm:$0xff]  ;;  %v188_v31 = vld [vmem:[%s2014_s3 + $0xf8] sm:$0xff] }
  0x27   : > { %v1307_v42 = vsel %vm742_vm9, %v174_v39, -inf  ;;  %vm743_vm10 = vcmp.lt.s32.totalorder %v364_v40, %v2017_v5  ;;  %vm744_vm11 = vcmp.lt.s32.totalorder %v365_v44, %v2017_v5  ;;  %v367_v52 = vadd.s32 168, %v2007_v2  ;;  %v189_v35 = vld [vmem:[%s2014_s3 + $0x100] sm:$0xff]  ;;  %v190_v39 = vld [vmem:[%s2014_s3 + $0x108] sm:$0xff] }
  0x28   : > { %v1485_v25 = vmax.f32 %v1302_v22, %v1484_v21  ;;  %v1308_v46 = vsel %vm743_vm10, %v175_v43, -inf  ;;  %v1309_v50 = vsel %vm744_vm11, %v176_v47, -inf  ;;  %vm745_vm12 = vcmp.lt.s32.totalorder %v366_v48, %v2017_v5  ;;  %v186_v22 = vld [vmem:[%s2014_s3 + $0xe8] sm:$0xff]  ;;  %v191_v43 = vld [vmem:[%s2014_s3 + $0x110] sm:$0xff]  ;;  %v192_v47 = vld [vmem:[%s2014_s3 + $0x118] sm:$0xff] }
  0x29   : > { %v1310_v54 = vsel %vm745_vm12, %v177_v51, -inf  ;;  %v368_v56 = vadd.s32 176, %v2007_v2  ;;  %vm746_vm13 = vcmp.lt.s32.totalorder %v367_v52, %v2017_v5  ;;  %v369_v60 = vadd.s32 184, %v2007_v2  ;;  %v193_v51 = vld [vmem:[%s2014_s3 + $0x120] sm:$0xff] }
  0x2a   : > { %v1486_v29 = vmax.f32 %v1303_v26, %v1485_v25  ;;  %v1311_v58 = vsel %vm746_vm13, %v178_v55, -inf  ;;  %v370_v0 = vadd.s32 192, %v2007_v2  ;;  %v371_v6 = vadd.s32 200, %v2007_v2  ;;  %v194_v55 = vld [vmem:[%s2014_s3 + $0x128] sm:$0xff] }
  0x2b   : > { %vm747_vm14 = vcmp.lt.s32.totalorder %v368_v56, %v2017_v5  ;;  %vm748_vm15 = vcmp.lt.s32.totalorder %v369_v60, %v2017_v5  ;;  %v372_v10 = vadd.s32 208, %v2007_v2  ;;  %v373_v14 = vadd.s32 216, %v2007_v2 }
  0x2c   : > { %v1487_v33 = vmax.f32 %v1304_v30, %v1486_v29  ;;  %v1312_v62 = vsel %vm747_vm14, %v179_v59, -inf  ;;  %v1313_v3 = vsel %vm748_vm15, %v180_v63, -inf  ;;  %vm749_vm0 = vcmp.lt.s32.totalorder %v370_v0, %v2017_v5  ;;  %v195_v59 = vld [vmem:[%s2014_s3 + $0x130] sm:$0xff]  ;;  %v196_v63 = vld [vmem:[%s2014_s3 + $0x138] sm:$0xff] }
  0x2d   : > { %v1314_v8 = vsel %vm749_vm0, %v181_v4, -inf  ;;  %vm750_vm1 = vcmp.lt.s32.totalorder %v371_v6, %v2017_v5  ;;  %v374_v15 = vadd.s32 224, %v2007_v2  ;;  %vm751_vm2 = vcmp.lt.s32.totalorder %v372_v10, %v2017_v5  ;;  %v197_v4 = vld [vmem:[%s2014_s3 + $0x140] sm:$0xff] }
  0x2e   : > { %v1488_v37 = vmax.f32 %v1305_v34, %v1487_v33  ;;  %v1315_v12 = vsel %vm750_vm1, %v182_v9, -inf  ;;  %v375_v16 = vadd.s32 232, %v2007_v2  ;;  %v1316_v18 = vsel %vm751_vm2, %v183_v13, -inf  ;;  %v198_v9 = vld [vmem:[%s2014_s3 + $0x148] sm:$0xff]  ;;  %v199_v13 = vld [vmem:[%s2014_s3 + $0x150] sm:$0xff] }
  0x2f   : > { %v376_v21 = vadd.s32 240, %v2007_v2  ;;  %vm752_vm3 = vcmp.lt.s32.totalorder %v373_v14, %v2017_v5  ;;  %vm753_vm4 = vcmp.lt.s32.totalorder %v374_v15, %v2017_v5  ;;  %v377_v23 = vadd.s32 248, %v2007_v2 }
  0x30   : > { %v1489_v41 = vmax.f32 %v1306_v38, %v1488_v37  ;;  %vm754_vm5 = vcmp.lt.s32.totalorder %v375_v16, %v2017_v5  ;;  %v1317_v25 = vsel %vm752_vm3, %v184_v19, -inf  ;;  %v1318_v26 = vsel %vm753_vm4, %v185_v20, -inf }
  0x31   : > { %v378_v28 = vadd.s32 256, %v2007_v2  ;;  %vm755_vm6 = vcmp.lt.s32.totalorder %v376_v21, %v2017_v5  ;;  %v1319_v30 = vsel %vm754_vm5, %v186_v22, -inf  ;;  %v379_v32 = vadd.s32 264, %v2007_v2  ;;  %v201_v21 = vld [vmem:[%s2014_s3 + $0x160] sm:$0xff] }
  0x32   : > { %v1490_v45 = vmax.f32 %v1307_v42, %v1489_v41  ;;  %vm756_vm7 = vcmp.lt.s32.totalorder %v377_v23, %v2017_v5  ;;  %v1320_v34 = vsel %vm755_vm6, %v187_v27, -inf  ;;  %v380_v36 = vadd.s32 272, %v2007_v2 }
  0x33   : > { %vm757_vm8 = vcmp.lt.s32.totalorder %v378_v28, %v2017_v5  ;;  %v1321_v38 = vsel %vm756_vm7, %v188_v31, -inf  ;;  %v381_v40 = vadd.s32 280, %v2007_v2  ;;  %vm758_vm9 = vcmp.lt.s32.totalorder %v379_v32, %v2017_v5 }
  0x34   : > { %v1491_v49 = vmax.f32 %v1308_v46, %v1490_v45  ;;  %v1322_v42 = vsel %vm757_vm8, %v189_v35, -inf  ;;  %v382_v44 = vadd.s32 288, %v2007_v2  ;;  %vm759_vm10 = vcmp.lt.s32.totalorder %v380_v36, %v2017_v5 }
  0x35   : > { %v1323_v46 = vsel %vm758_vm9, %v190_v39, -inf  ;;  %v383_v48 = vadd.s32 296, %v2007_v2  ;;  %vm760_vm11 = vcmp.lt.s32.totalorder %v381_v40, %v2017_v5  ;;  %v384_v52 = vadd.s32 304, %v2007_v2 }
  0x36   : > { %v1492_v53 = vmax.f32 %v1309_v50, %v1491_v49  ;;  %v1324_v50 = vsel %vm759_vm10, %v191_v43, -inf  ;;  %vm761_vm12 = vcmp.lt.s32.totalorder %v382_v44, %v2017_v5  ;;  %v385_v56 = vadd.s32 312, %v2007_v2 }
  0x37   : > { %vm762_vm13 = vcmp.lt.s32.totalorder %v383_v48, %v2017_v5  ;;  %v386_v60 = vadd.s32 320, %v2007_v2  ;;  %vm763_vm14 = vcmp.lt.s32.totalorder %v384_v52, %v2017_v5  ;;  %v387_v0 = vadd.s32 328, %v2007_v2 }
  0x38   : > { %v1493_v57 = vmax.f32 %v1310_v54, %v1492_v53  ;;  %v1325_v54 = vsel %vm760_vm11, %v192_v47, -inf  ;;  %vm764_vm15 = vcmp.lt.s32.totalorder %v385_v56, %v2017_v5  ;;  %v388_v6 = vadd.s32 336, %v2007_v2 }
  0x39   : > { %vm765_vm0 = vcmp.lt.s32.totalorder %v386_v60, %v2017_v5  ;;  %v389_v10 = vadd.s32 344, %v2007_v2  ;;  %vm766_vm1 = vcmp.lt.s32.totalorder %v387_v0, %v2017_v5  ;;  %v390_v14 = vadd.s32 352, %v2007_v2 }
  0x3a   : > { %v1494_v61 = vmax.f32 %v1311_v58, %v1493_v57  ;;  %v1326_v58 = vsel %vm761_vm12, %v193_v51, -inf  ;;  %vm767_vm2 = vcmp.lt.s32.totalorder %v388_v6, %v2017_v5  ;;  %v1331_v16 = vsel %vm766_vm1, %v198_v9, -inf }
  0x3b   : > { %vm768_vm3 = vcmp.lt.s32.totalorder %v389_v10, %v2017_v5  ;;  %v1332_v20 = vsel %vm767_vm2, %v199_v13, -inf  ;;  %v392_v22 = vadd.s32 368, %v2007_v2  ;;  %vm769_vm4 = vcmp.lt.s32.totalorder %v390_v14, %v2017_v5 }
  0x3c   : > { %v1495_v1 = vmax.f32 %v1312_v62, %v1494_v61  ;;  %v1327_v62 = vsel %vm762_vm13, %v194_v55, -inf  ;;  %v1334_v28 = vsel %vm769_vm4, %v201_v21, -inf }
  0x3d   : > { %vm771_vm6 = vcmp.lt.s32.totalorder %v392_v22, %v2017_v5 }
  0x3e   : > { %v1496_v7 = vmax.f32 %v1313_v3, %v1495_v1  ;;  %v1328_v3 = vsel %vm763_vm14, %v195_v59, -inf }
  0x40   : > { %v1497_v11 = vmax.f32 %v1314_v8, %v1496_v7  ;;  %v1329_v8 = vsel %vm764_vm15, %v196_v63, -inf }
  0x42   : > { %v1498_v17 = vmax.f32 %v1315_v12, %v1497_v11  ;;  %v1330_v12 = vsel %vm765_vm0, %v197_v4, -inf }
  0x44   : > { %v1499_v24 = vmax.f32 %v1316_v18, %v1498_v17  ;;  %v200_v17 = vld [vmem:[%s2014_s3 + $0x158] sm:$0xff]  ;;  %v391_v18 = vadd.s32 360, %v2007_v2 }
  0x46   : > { %v1500_v29 = vmax.f32 %v1317_v25, %v1499_v24  ;;  %v1333_v24 = vsel %vm768_vm3, %v200_v17, -inf  ;;  %v202_v25 = vld [vmem:[%s2014_s3 + $0x168] sm:$0xff]  ;;  %vm770_vm5 = vcmp.lt.s32.totalorder %v391_v18, %v2017_v5 }
  0x47   : > { %v1335_v32 = vsel %vm770_vm5, %v202_v25, -inf }
  0x48   : > { %v1501_v33 = vmax.f32 %v1318_v26, %v1500_v29  ;;  %v393_v26 = vadd.s32 376, %v2007_v2  ;;  %v203_v29 = vld [vmem:[%s2014_s3 + $0x170] sm:$0xff] }
  0x49   : > { %v1336_v36 = vsel %vm771_vm6, %v203_v29, -inf }
  0x4a   : > { %v1502_v37 = vmax.f32 %v1319_v30, %v1501_v33  ;;  %v394_v30 = vadd.s32 384, %v2007_v2  ;;  %v204_v33 = vld [vmem:[%s2014_s3 + $0x178] sm:$0xff]  ;;  %vm772_vm7 = vcmp.lt.s32.totalorder %v393_v26, %v2017_v5 }
  0x4b   : > { %v1337_v40 = vsel %vm772_vm7, %v204_v33, -inf }
  0x4c   : > { %v1503_v41 = vmax.f32 %v1320_v34, %v1502_v37  ;;  %v395_v34 = vadd.s32 392, %v2007_v2  ;;  %v205_v37 = vld [vmem:[%s2014_s3 + $0x180] sm:$0xff]  ;;  %vm773_vm8 = vcmp.lt.s32.totalorder %v394_v30, %v2017_v5 }
  0x4d   : > { %v1338_v44 = vsel %vm773_vm8, %v205_v37, -inf }
  0x4e   : > { %v1504_v45 = vmax.f32 %v1321_v38, %v1503_v41  ;;  %v396_v38 = vadd.s32 400, %v2007_v2  ;;  %v206_v41 = vld [vmem:[%s2014_s3 + $0x188] sm:$0xff]  ;;  %vm774_vm9 = vcmp.lt.s32.totalorder %v395_v34, %v2017_v5 }
  0x4f   : > { %v1339_v48 = vsel %vm774_vm9, %v206_v41, -inf }
  0x50   : > { %v1505_v49 = vmax.f32 %v1322_v42, %v1504_v45  ;;  %v397_v42 = vadd.s32 408, %v2007_v2  ;;  %v207_v45 = vld [vmem:[%s2014_s3 + $0x190] sm:$0xff]  ;;  %vm775_vm10 = vcmp.lt.s32.totalorder %v396_v38, %v2017_v5 }
  0x51   : > { %v1340_v52 = vsel %vm775_vm10, %v207_v45, -inf }
  0x52   : > { %v1506_v53 = vmax.f32 %v1323_v46, %v1505_v49  ;;  %v398_v46 = vadd.s32 416, %v2007_v2  ;;  %v208_v49 = vld [vmem:[%s2014_s3 + $0x198] sm:$0xff]  ;;  %vm776_vm11 = vcmp.lt.s32.totalorder %v397_v42, %v2017_v5 }
  0x53   : > { %v1341_v56 = vsel %vm776_vm11, %v208_v49, -inf }
  0x54   : > { %v1507_v57 = vmax.f32 %v1324_v50, %v1506_v53  ;;  %v399_v50 = vadd.s32 424, %v2007_v2  ;;  %v209_v53 = vld [vmem:[%s2014_s3 + $0x1a0] sm:$0xff]  ;;  %vm777_vm12 = vcmp.lt.s32.totalorder %v398_v46, %v2017_v5 }
  0x55   : > { %v1342_v60 = vsel %vm777_vm12, %v209_v53, -inf }
  0x56   : > { %v1508_v61 = vmax.f32 %v1325_v54, %v1507_v57  ;;  %v400_v54 = vadd.s32 432, %v2007_v2  ;;  %v210_v57 = vld [vmem:[%s2014_s3 + $0x1a8] sm:$0xff]  ;;  %vm778_vm13 = vcmp.lt.s32.totalorder %v399_v50, %v2017_v5 }
  0x57   : > { %v1343_v0 = vsel %vm778_vm13, %v210_v57, -inf }
  0x58   : > { %v1509_v1 = vmax.f32 %v1326_v58, %v1508_v61  ;;  %v401_v58 = vadd.s32 440, %v2007_v2  ;;  %v211_v61 = vld [vmem:[%s2014_s3 + $0x1b0] sm:$0xff]  ;;  %vm779_vm14 = vcmp.lt.s32.totalorder %v400_v54, %v2017_v5 }
  0x59   : > { %v1344_v6 = vsel %vm779_vm14, %v211_v61, -inf }
  0x5a   : > { %v1510_v7 = vmax.f32 %v1327_v62, %v1509_v1  ;;  %v402_v62 = vadd.s32 448, %v2007_v2  ;;  %v212_v1 = vld [vmem:[%s2014_s3 + $0x1b8] sm:$0xff]  ;;  %vm780_vm15 = vcmp.lt.s32.totalorder %v401_v58, %v2017_v5 }
  0x5b   : > { %v1345_v10 = vsel %vm780_vm15, %v212_v1, -inf }
  0x5c   : > { %v1511_v11 = vmax.f32 %v1328_v3, %v1510_v7  ;;  %v403_v3 = vadd.s32 456, %v2007_v2  ;;  %v213_v7 = vld [vmem:[%s2014_s3 + $0x1c0] sm:$0xff]  ;;  %vm781_vm0 = vcmp.lt.s32.totalorder %v402_v62, %v2017_v5 }
  0x5d   : > { %v1346_v14 = vsel %vm781_vm0, %v213_v7, -inf }
  0x5e   : > { %v1512_v15 = vmax.f32 %v1329_v8, %v1511_v11  ;;  %v404_v8 = vadd.s32 464, %v2007_v2  ;;  %v214_v11 = vld [vmem:[%s2014_s3 + $0x1c8] sm:$0xff]  ;;  %vm782_vm1 = vcmp.lt.s32.totalorder %v403_v3, %v2017_v5 }
  0x5f   : > { %v1347_v18 = vsel %vm782_vm1, %v214_v11, -inf }
  0x60   : > { %v1513_v19 = vmax.f32 %v1330_v12, %v1512_v15  ;;  %v405_v12 = vadd.s32 472, %v2007_v2  ;;  %v215_v15 = vld [vmem:[%s2014_s3 + $0x1d0] sm:$0xff]  ;;  %vm783_vm2 = vcmp.lt.s32.totalorder %v404_v8, %v2017_v5 }
  0x61   : > { %v1348_v22 = vsel %vm783_vm2, %v215_v15, -inf }
  0x62   : > { %v1514_v23 = vmax.f32 %v1331_v16, %v1513_v19  ;;  %v406_v16 = vadd.s32 480, %v2007_v2  ;;  %v216_v19 = vld [vmem:[%s2014_s3 + $0x1d8] sm:$0xff]  ;;  %vm784_vm3 = vcmp.lt.s32.totalorder %v405_v12, %v2017_v5 }
  0x63   : > { %v1349_v26 = vsel %vm784_vm3, %v216_v19, -inf }
  0x64   : > { %v1515_v27 = vmax.f32 %v1332_v20, %v1514_v23  ;;  %v407_v20 = vadd.s32 488, %v2007_v2  ;;  %v217_v23 = vld [vmem:[%s2014_s3 + $0x1e0] sm:$0xff]  ;;  %vm785_vm4 = vcmp.lt.s32.totalorder %v406_v16, %v2017_v5 }
  0x65   : > { %v1350_v30 = vsel %vm785_vm4, %v217_v23, -inf }
  0x66   : > { %v1516_v31 = vmax.f32 %v1333_v24, %v1515_v27  ;;  %v408_v24 = vadd.s32 496, %v2007_v2  ;;  %v218_v27 = vld [vmem:[%s2014_s3 + $0x1e8] sm:$0xff]  ;;  %vm786_vm5 = vcmp.lt.s32.totalorder %v407_v20, %v2017_v5 }
  0x67   : > { %v1351_v34 = vsel %vm786_vm5, %v218_v27, -inf }
  0x68   : > { %v1517_v35 = vmax.f32 %v1334_v28, %v1516_v31  ;;  %v409_v28 = vadd.s32 504, %v2007_v2  ;;  %v219_v31 = vld [vmem:[%s2014_s3 + $0x1f0] sm:$0xff]  ;;  %vm787_vm6 = vcmp.lt.s32.totalorder %v408_v24, %v2017_v5 }
  0x69   : > { %v1352_v38 = vsel %vm787_vm6, %v219_v31, -inf }
  0x6a   : > { %v1518_v39 = vmax.f32 %v1335_v32, %v1517_v35  ;;  %v410_v32 = vadd.s32 512, %v2007_v2  ;;  %v220_v35 = vld [vmem:[%s2014_s3 + $0x1f8] sm:$0xff]  ;;  %vm788_vm7 = vcmp.lt.s32.totalorder %v409_v28, %v2017_v5 }
  0x6b   : > { %v1353_v42 = vsel %vm788_vm7, %v220_v35, -inf }
  0x6c   : > { %v1519_v43 = vmax.f32 %v1336_v36, %v1518_v39  ;;  %v411_v36 = vadd.s32 520, %v2007_v2  ;;  %v221_v39 = vld [vmem:[%s2014_s3 + $0x200] sm:$0xff]  ;;  %vm789_vm8 = vcmp.lt.s32.totalorder %v410_v32, %v2017_v5 }
  0x6d   : > { %v1354_v46 = vsel %vm789_vm8, %v221_v39, -inf }
  0x6e   : > { %v1520_v47 = vmax.f32 %v1337_v40, %v1519_v43  ;;  %v412_v40 = vadd.s32 528, %v2007_v2  ;;  %v222_v43 = vld [vmem:[%s2014_s3 + $0x208] sm:$0xff]  ;;  %vm790_vm9 = vcmp.lt.s32.totalorder %v411_v36, %v2017_v5 }
  0x6f   : > { %v1355_v50 = vsel %vm790_vm9, %v222_v43, -inf }
  0x70   : > { %v1521_v51 = vmax.f32 %v1338_v44, %v1520_v47  ;;  %v413_v44 = vadd.s32 536, %v2007_v2  ;;  %v223_v47 = vld [vmem:[%s2014_s3 + $0x210] sm:$0xff]  ;;  %vm791_vm10 = vcmp.lt.s32.totalorder %v412_v40, %v2017_v5 }
  0x71   : > { %v1356_v54 = vsel %vm791_vm10, %v223_v47, -inf }
  0x72   : > { %v1522_v55 = vmax.f32 %v1339_v48, %v1521_v51  ;;  %v414_v48 = vadd.s32 544, %v2007_v2  ;;  %v224_v51 = vld [vmem:[%s2014_s3 + $0x218] sm:$0xff]  ;;  %vm792_vm11 = vcmp.lt.s32.totalorder %v413_v44, %v2017_v5 }
  0x73   : > { %v1357_v58 = vsel %vm792_vm11, %v224_v51, -inf }
  0x74   : > { %v1523_v59 = vmax.f32 %v1340_v52, %v1522_v55  ;;  %v415_v52 = vadd.s32 552, %v2007_v2  ;;  %v225_v55 = vld [vmem:[%s2014_s3 + $0x220] sm:$0xff]  ;;  %vm793_vm12 = vcmp.lt.s32.totalorder %v414_v48, %v2017_v5 }
  0x75   : > { %v1358_v62 = vsel %vm793_vm12, %v225_v55, -inf }
  0x76   : > { %v1524_v63 = vmax.f32 %v1341_v56, %v1523_v59  ;;  %v416_v56 = vadd.s32 560, %v2007_v2  ;;  %v226_v59 = vld [vmem:[%s2014_s3 + $0x228] sm:$0xff]  ;;  %vm794_vm13 = vcmp.lt.s32.totalorder %v415_v52, %v2017_v5 }
  0x77   : > { %v1359_v3 = vsel %vm794_vm13, %v226_v59, -inf }
  0x78   : > { %v1525_v4 = vmax.f32 %v1342_v60, %v1524_v63  ;;  %v417_v60 = vadd.s32 568, %v2007_v2  ;;  %v227_v63 = vld [vmem:[%s2014_s3 + $0x230] sm:$0xff]  ;;  %vm795_vm14 = vcmp.lt.s32.totalorder %v416_v56, %v2017_v5 }
  0x79   : > { %v1360_v8 = vsel %vm795_vm14, %v227_v63, -inf }
  0x7a   : > { %v1526_v9 = vmax.f32 %v1343_v0, %v1525_v4  ;;  %v418_v0 = vadd.s32 576, %v2007_v2  ;;  %v228_v4 = vld [vmem:[%s2014_s3 + $0x238] sm:$0xff]  ;;  %vm796_vm15 = vcmp.lt.s32.totalorder %v417_v60, %v2017_v5 }
  0x7b   : > { %v1361_v12 = vsel %vm796_vm15, %v228_v4, -inf }
  0x7c   : > { %v1527_v13 = vmax.f32 %v1344_v6, %v1526_v9  ;;  %v419_v6 = vadd.s32 584, %v2007_v2  ;;  %v229_v9 = vld [vmem:[%s2014_s3 + $0x240] sm:$0xff]  ;;  %vm797_vm0 = vcmp.lt.s32.totalorder %v418_v0, %v2017_v5 }
  0x7d   : > { %v1362_v16 = vsel %vm797_vm0, %v229_v9, -inf }
  0x7e   : > { %v1528_v17 = vmax.f32 %v1345_v10, %v1527_v13  ;;  %v420_v10 = vadd.s32 592, %v2007_v2  ;;  %v230_v13 = vld [vmem:[%s2014_s3 + $0x248] sm:$0xff]  ;;  %vm798_vm1 = vcmp.lt.s32.totalorder %v419_v6, %v2017_v5 }
  0x7f   : > { %v1363_v20 = vsel %vm798_vm1, %v230_v13, -inf }
  0x80   : > { %v1529_v21 = vmax.f32 %v1346_v14, %v1528_v17  ;;  %v421_v14 = vadd.s32 600, %v2007_v2  ;;  %v231_v17 = vld [vmem:[%s2014_s3 + $0x250] sm:$0xff]  ;;  %vm799_vm2 = vcmp.lt.s32.totalorder %v420_v10, %v2017_v5 }
  0x81   : > { %v1364_v24 = vsel %vm799_vm2, %v231_v17, -inf }
  0x82   : > { %v1530_v25 = vmax.f32 %v1347_v18, %v1529_v21  ;;  %v422_v18 = vadd.s32 608, %v2007_v2  ;;  %v232_v21 = vld [vmem:[%s2014_s3 + $0x258] sm:$0xff]  ;;  %vm800_vm3 = vcmp.lt.s32.totalorder %v421_v14, %v2017_v5 }
  0x83   : > { %v1365_v28 = vsel %vm800_vm3, %v232_v21, -inf }
  0x84   : > { %v1531_v29 = vmax.f32 %v1348_v22, %v1530_v25  ;;  %v423_v22 = vadd.s32 616, %v2007_v2  ;;  %v233_v25 = vld [vmem:[%s2014_s3 + $0x260] sm:$0xff]  ;;  %vm801_vm4 = vcmp.lt.s32.totalorder %v422_v18, %v2017_v5 }
  0x85   : > { %v1366_v32 = vsel %vm801_vm4, %v233_v25, -inf }
  0x86   : > { %v1532_v33 = vmax.f32 %v1349_v26, %v1531_v29  ;;  %v424_v26 = vadd.s32 624, %v2007_v2  ;;  %v234_v29 = vld [vmem:[%s2014_s3 + $0x268] sm:$0xff]  ;;  %vm802_vm5 = vcmp.lt.s32.totalorder %v423_v22, %v2017_v5 }
  0x87   : > { %v1367_v36 = vsel %vm802_vm5, %v234_v29, -inf }
  0x88   : > { %v1533_v37 = vmax.f32 %v1350_v30, %v1532_v33  ;;  %v425_v30 = vadd.s32 632, %v2007_v2  ;;  %v235_v33 = vld [vmem:[%s2014_s3 + $0x270] sm:$0xff]  ;;  %vm803_vm6 = vcmp.lt.s32.totalorder %v424_v26, %v2017_v5 }
  0x89   : > { %v1368_v40 = vsel %vm803_vm6, %v235_v33, -inf }
  0x8a   : > { %v1534_v41 = vmax.f32 %v1351_v34, %v1533_v37  ;;  %v426_v34 = vadd.s32 640, %v2007_v2  ;;  %v236_v37 = vld [vmem:[%s2014_s3 + $0x278] sm:$0xff]  ;;  %vm804_vm7 = vcmp.lt.s32.totalorder %v425_v30, %v2017_v5 }
  0x8b   : > { %v1369_v44 = vsel %vm804_vm7, %v236_v37, -inf }
  0x8c   : > { %v1535_v45 = vmax.f32 %v1352_v38, %v1534_v41  ;;  %v427_v38 = vadd.s32 648, %v2007_v2  ;;  %v237_v41 = vld [vmem:[%s2014_s3 + $0x280] sm:$0xff]  ;;  %vm805_vm8 = vcmp.lt.s32.totalorder %v426_v34, %v2017_v5 }
  0x8d   : > { %v1370_v48 = vsel %vm805_vm8, %v237_v41, -inf }
  0x8e   : > { %v1536_v49 = vmax.f32 %v1353_v42, %v1535_v45  ;;  %v428_v42 = vadd.s32 656, %v2007_v2  ;;  %v238_v45 = vld [vmem:[%s2014_s3 + $0x288] sm:$0xff]  ;;  %vm806_vm9 = vcmp.lt.s32.totalorder %v427_v38, %v2017_v5 }
  0x8f   : > { %v1371_v52 = vsel %vm806_vm9, %v238_v45, -inf }
  0x90   : > { %v1537_v53 = vmax.f32 %v1354_v46, %v1536_v49  ;;  %v429_v46 = vadd.s32 664, %v2007_v2  ;;  %v239_v49 = vld [vmem:[%s2014_s3 + $0x290] sm:$0xff]  ;;  %vm807_vm10 = vcmp.lt.s32.totalorder %v428_v42, %v2017_v5 }
  0x91   : > { %v1372_v56 = vsel %vm807_vm10, %v239_v49, -inf }
  0x92   : > { %v1538_v57 = vmax.f32 %v1355_v50, %v1537_v53  ;;  %v430_v50 = vadd.s32 672, %v2007_v2  ;;  %v240_v53 = vld [vmem:[%s2014_s3 + $0x298] sm:$0xff]  ;;  %vm808_vm11 = vcmp.lt.s32.totalorder %v429_v46, %v2017_v5 }
  0x93   : > { %v1373_v60 = vsel %vm808_vm11, %v240_v53, -inf }
  0x94   : > { %v1539_v61 = vmax.f32 %v1356_v54, %v1538_v57  ;;  %v431_v54 = vadd.s32 680, %v2007_v2  ;;  %v241_v57 = vld [vmem:[%s2014_s3 + $0x2a0] sm:$0xff]  ;;  %vm809_vm12 = vcmp.lt.s32.totalorder %v430_v50, %v2017_v5 }
  0x95   : > { %v1374_v0 = vsel %vm809_vm12, %v241_v57, -inf }
  0x96   : > { %v1540_v1 = vmax.f32 %v1357_v58, %v1539_v61  ;;  %v432_v58 = vadd.s32 688, %v2007_v2  ;;  %v242_v61 = vld [vmem:[%s2014_s3 + $0x2a8] sm:$0xff]  ;;  %vm810_vm13 = vcmp.lt.s32.totalorder %v431_v54, %v2017_v5 }
  0x97   : > { %v1375_v6 = vsel %vm810_vm13, %v242_v61, -inf }
  0x98   : > { %v1541_v7 = vmax.f32 %v1358_v62, %v1540_v1  ;;  %v433_v62 = vadd.s32 696, %v2007_v2  ;;  %v243_v1 = vld [vmem:[%s2014_s3 + $0x2b0] sm:$0xff]  ;;  %vm811_vm14 = vcmp.lt.s32.totalorder %v432_v58, %v2017_v5 }
  0x99   : > { %v1376_v10 = vsel %vm811_vm14, %v243_v1, -inf }
  0x9a   : > { %v1542_v11 = vmax.f32 %v1359_v3, %v1541_v7  ;;  %v434_v3 = vadd.s32 704, %v2007_v2  ;;  %v244_v7 = vld [vmem:[%s2014_s3 + $0x2b8] sm:$0xff]  ;;  %vm812_vm15 = vcmp.lt.s32.totalorder %v433_v62, %v2017_v5 }
  0x9b   : > { %v1377_v14 = vsel %vm812_vm15, %v244_v7, -inf }
  0x9c   : > { %v1543_v15 = vmax.f32 %v1360_v8, %v1542_v11  ;;  %v435_v8 = vadd.s32 712, %v2007_v2  ;;  %v245_v11 = vld [vmem:[%s2014_s3 + $0x2c0] sm:$0xff]  ;;  %vm813_vm0 = vcmp.lt.s32.totalorder %v434_v3, %v2017_v5 }
  0x9d   : > { %v1378_v18 = vsel %vm813_vm0, %v245_v11, -inf }
  0x9e   : > { %v1544_v19 = vmax.f32 %v1361_v12, %v1543_v15  ;;  %v436_v12 = vadd.s32 720, %v2007_v2  ;;  %v246_v15 = vld [vmem:[%s2014_s3 + $0x2c8] sm:$0xff]  ;;  %vm814_vm1 = vcmp.lt.s32.totalorder %v435_v8, %v2017_v5 }
  0x9f   : > { %v1379_v22 = vsel %vm814_vm1, %v246_v15, -inf }
  0xa0   : > { %v1545_v23 = vmax.f32 %v1362_v16, %v1544_v19  ;;  %v437_v16 = vadd.s32 728, %v2007_v2  ;;  %v247_v19 = vld [vmem:[%s2014_s3 + $0x2d0] sm:$0xff]  ;;  %vm815_vm2 = vcmp.lt.s32.totalorder %v436_v12, %v2017_v5 }
  0xa1   : > { %v1380_v26 = vsel %vm815_vm2, %v247_v19, -inf }
  0xa2   : > { %v1546_v27 = vmax.f32 %v1363_v20, %v1545_v23  ;;  %v438_v20 = vadd.s32 736, %v2007_v2  ;;  %v248_v23 = vld [vmem:[%s2014_s3 + $0x2d8] sm:$0xff]  ;;  %vm816_vm3 = vcmp.lt.s32.totalorder %v437_v16, %v2017_v5 }
  0xa3   : > { %v1381_v30 = vsel %vm816_vm3, %v248_v23, -inf }
  0xa4   : > { %v1547_v31 = vmax.f32 %v1364_v24, %v1546_v27  ;;  %v439_v24 = vadd.s32 744, %v2007_v2  ;;  %v249_v27 = vld [vmem:[%s2014_s3 + $0x2e0] sm:$0xff]  ;;  %vm817_vm4 = vcmp.lt.s32.totalorder %v438_v20, %v2017_v5 }
  0xa5   : > { %v1382_v34 = vsel %vm817_vm4, %v249_v27, -inf }
  0xa6   : > { %v1548_v35 = vmax.f32 %v1365_v28, %v1547_v31  ;;  %v440_v28 = vadd.s32 752, %v2007_v2  ;;  %v250_v31 = vld [vmem:[%s2014_s3 + $0x2e8] sm:$0xff]  ;;  %vm818_vm5 = vcmp.lt.s32.totalorder %v439_v24, %v2017_v5 }
  0xa7   : > { %v1383_v38 = vsel %vm818_vm5, %v250_v31, -inf }
  0xa8   : > { %v1549_v39 = vmax.f32 %v1366_v32, %v1548_v35  ;;  %v441_v32 = vadd.s32 760, %v2007_v2  ;;  %v251_v35 = vld [vmem:[%s2014_s3 + $0x2f0] sm:$0xff]  ;;  %vm819_vm6 = vcmp.lt.s32.totalorder %v440_v28, %v2017_v5 }
  0xa9   : > { %v1384_v42 = vsel %vm819_vm6, %v251_v35, -inf }
  0xaa   : > { %v1550_v43 = vmax.f32 %v1367_v36, %v1549_v39  ;;  %v442_v36 = vadd.s32 768, %v2007_v2  ;;  %v252_v39 = vld [vmem:[%s2014_s3 + $0x2f8] sm:$0xff]  ;;  %vm820_vm7 = vcmp.lt.s32.totalorder %v441_v32, %v2017_v5 }
  0xab   : > { %v1385_v46 = vsel %vm820_vm7, %v252_v39, -inf }
  0xac   : > { %v1551_v47 = vmax.f32 %v1368_v40, %v1550_v43  ;;  %v443_v40 = vadd.s32 776, %v2007_v2  ;;  %v253_v43 = vld [vmem:[%s2014_s3 + $0x300] sm:$0xff]  ;;  %vm821_vm8 = vcmp.lt.s32.totalorder %v442_v36, %v2017_v5 }
  0xad   : > { %v1386_v50 = vsel %vm821_vm8, %v253_v43, -inf }
  0xae   : > { %v1552_v51 = vmax.f32 %v1369_v44, %v1551_v47  ;;  %v444_v44 = vadd.s32 784, %v2007_v2  ;;  %v254_v47 = vld [vmem:[%s2014_s3 + $0x308] sm:$0xff]  ;;  %vm822_vm9 = vcmp.lt.s32.totalorder %v443_v40, %v2017_v5 }
  0xaf   : > { %v1387_v54 = vsel %vm822_vm9, %v254_v47, -inf }
  0xb0   : > { %v1553_v55 = vmax.f32 %v1370_v48, %v1552_v51  ;;  %v445_v48 = vadd.s32 792, %v2007_v2  ;;  %v255_v51 = vld [vmem:[%s2014_s3 + $0x310] sm:$0xff]  ;;  %vm823_vm10 = vcmp.lt.s32.totalorder %v444_v44, %v2017_v5 }
  0xb1   : > { %v1388_v58 = vsel %vm823_vm10, %v255_v51, -inf }
  0xb2   : > { %v1554_v59 = vmax.f32 %v1371_v52, %v1553_v55  ;;  %v446_v52 = vadd.s32 800, %v2007_v2  ;;  %v256_v55 = vld [vmem:[%s2014_s3 + $0x318] sm:$0xff]  ;;  %vm824_vm11 = vcmp.lt.s32.totalorder %v445_v48, %v2017_v5 }
  0xb3   : > { %v1389_v62 = vsel %vm824_vm11, %v256_v55, -inf }
  0xb4   : > { %v1555_v63 = vmax.f32 %v1372_v56, %v1554_v59  ;;  %v447_v56 = vadd.s32 808, %v2007_v2  ;;  %v257_v59 = vld [vmem:[%s2014_s3 + $0x320] sm:$0xff]  ;;  %vm825_vm12 = vcmp.lt.s32.totalorder %v446_v52, %v2017_v5 }
  0xb5   : > { %v1390_v3 = vsel %vm825_vm12, %v257_v59, -inf }
  0xb6   : > { %v1556_v4 = vmax.f32 %v1373_v60, %v1555_v63  ;;  %v448_v60 = vadd.s32 816, %v2007_v2  ;;  %v258_v63 = vld [vmem:[%s2014_s3 + $0x328] sm:$0xff]  ;;  %vm826_vm13 = vcmp.lt.s32.totalorder %v447_v56, %v2017_v5 }
  0xb7   : > { %v1391_v8 = vsel %vm826_vm13, %v258_v63, -inf }
  0xb8   : > { %v1557_v9 = vmax.f32 %v1374_v0, %v1556_v4  ;;  %v449_v0 = vadd.s32 824, %v2007_v2  ;;  %v259_v4 = vld [vmem:[%s2014_s3 + $0x330] sm:$0xff]  ;;  %vm827_vm14 = vcmp.lt.s32.totalorder %v448_v60, %v2017_v5 }
  0xb9   : > { %v1392_v12 = vsel %vm827_vm14, %v259_v4, -inf }
  0xba   : > { %v1558_v13 = vmax.f32 %v1375_v6, %v1557_v9  ;;  %v450_v6 = vadd.s32 832, %v2007_v2  ;;  %v260_v9 = vld [vmem:[%s2014_s3 + $0x338] sm:$0xff]  ;;  %vm828_vm15 = vcmp.lt.s32.totalorder %v449_v0, %v2017_v5 }
  0xbb   : > { %v1393_v16 = vsel %vm828_vm15, %v260_v9, -inf }
  0xbc   : > { %v1559_v17 = vmax.f32 %v1376_v10, %v1558_v13  ;;  %v451_v10 = vadd.s32 840, %v2007_v2  ;;  %v261_v13 = vld [vmem:[%s2014_s3 + $0x340] sm:$0xff]  ;;  %vm829_vm0 = vcmp.lt.s32.totalorder %v450_v6, %v2017_v5 }
  0xbd   : > { %v1394_v20 = vsel %vm829_vm0, %v261_v13, -inf }
  0xbe   : > { %v1560_v21 = vmax.f32 %v1377_v14, %v1559_v17  ;;  %v452_v14 = vadd.s32 848, %v2007_v2  ;;  %v262_v17 = vld [vmem:[%s2014_s3 + $0x348] sm:$0xff]  ;;  %vm830_vm1 = vcmp.lt.s32.totalorder %v451_v10, %v2017_v5 }
  0xbf   : > { %v1395_v24 = vsel %vm830_vm1, %v262_v17, -inf }
  0xc0   : > { %v1561_v25 = vmax.f32 %v1378_v18, %v1560_v21  ;;  %v453_v18 = vadd.s32 856, %v2007_v2  ;;  %v263_v21 = vld [vmem:[%s2014_s3 + $0x350] sm:$0xff]  ;;  %vm831_vm2 = vcmp.lt.s32.totalorder %v452_v14, %v2017_v5 }
  0xc1   : > { %v1396_v28 = vsel %vm831_vm2, %v263_v21, -inf }
  0xc2   : > { %v1562_v29 = vmax.f32 %v1379_v22, %v1561_v25  ;;  %v454_v22 = vadd.s32 864, %v2007_v2  ;;  %v264_v25 = vld [vmem:[%s2014_s3 + $0x358] sm:$0xff]  ;;  %vm832_vm3 = vcmp.lt.s32.totalorder %v453_v18, %v2017_v5 }
  0xc3   : > { %v1397_v32 = vsel %vm832_vm3, %v264_v25, -inf }
  0xc4   : > { %v1563_v33 = vmax.f32 %v1380_v26, %v1562_v29  ;;  %v455_v26 = vadd.s32 872, %v2007_v2  ;;  %v265_v29 = vld [vmem:[%s2014_s3 + $0x360] sm:$0xff]  ;;  %vm833_vm4 = vcmp.lt.s32.totalorder %v454_v22, %v2017_v5 }
  0xc5   : > { %v1398_v36 = vsel %vm833_vm4, %v265_v29, -inf }
  0xc6   : > { %v1564_v37 = vmax.f32 %v1381_v30, %v1563_v33  ;;  %v456_v30 = vadd.s32 880, %v2007_v2  ;;  %v266_v33 = vld [vmem:[%s2014_s3 + $0x368] sm:$0xff]  ;;  %vm834_vm5 = vcmp.lt.s32.totalorder %v455_v26, %v2017_v5 }
  0xc7   : > { %v1399_v40 = vsel %vm834_vm5, %v266_v33, -inf }
  0xc8   : > { %v1565_v41 = vmax.f32 %v1382_v34, %v1564_v37  ;;  %v457_v34 = vadd.s32 888, %v2007_v2  ;;  %v267_v37 = vld [vmem:[%s2014_s3 + $0x370] sm:$0xff]  ;;  %vm835_vm6 = vcmp.lt.s32.totalorder %v456_v30, %v2017_v5 }
  0xc9   : > { %v1400_v44 = vsel %vm835_vm6, %v267_v37, -inf }
  0xca   : > { %v1566_v45 = vmax.f32 %v1383_v38, %v1565_v41  ;;  %v458_v38 = vadd.s32 896, %v2007_v2  ;;  %v268_v41 = vld [vmem:[%s2014_s3 + $0x378] sm:$0xff]  ;;  %vm836_vm7 = vcmp.lt.s32.totalorder %v457_v34, %v2017_v5 }
  0xcb   : > { %v1401_v48 = vsel %vm836_vm7, %v268_v41, -inf }
  0xcc   : > { %v1567_v49 = vmax.f32 %v1384_v42, %v1566_v45  ;;  %v459_v42 = vadd.s32 904, %v2007_v2  ;;  %v269_v45 = vld [vmem:[%s2014_s3 + $0x380] sm:$0xff]  ;;  %vm837_vm8 = vcmp.lt.s32.totalorder %v458_v38, %v2017_v5 }
  0xcd   : > { %v1402_v52 = vsel %vm837_vm8, %v269_v45, -inf }
  0xce   : > { %v1568_v53 = vmax.f32 %v1385_v46, %v1567_v49  ;;  %v460_v46 = vadd.s32 912, %v2007_v2  ;;  %v270_v49 = vld [vmem:[%s2014_s3 + $0x388] sm:$0xff]  ;;  %vm838_vm9 = vcmp.lt.s32.totalorder %v459_v42, %v2017_v5 }
  0xcf   : > { %v1403_v56 = vsel %vm838_vm9, %v270_v49, -inf }
  0xd0   : > { %v1569_v57 = vmax.f32 %v1386_v50, %v1568_v53  ;;  %v461_v50 = vadd.s32 920, %v2007_v2  ;;  %v271_v53 = vld [vmem:[%s2014_s3 + $0x390] sm:$0xff]  ;;  %vm839_vm10 = vcmp.lt.s32.totalorder %v460_v46, %v2017_v5 }
  0xd1   : > { %v1404_v60 = vsel %vm839_vm10, %v271_v53, -inf }
  0xd2   : > { %v1570_v61 = vmax.f32 %v1387_v54, %v1569_v57  ;;  %v462_v54 = vadd.s32 928, %v2007_v2  ;;  %v272_v57 = vld [vmem:[%s2014_s3 + $0x398] sm:$0xff]  ;;  %vm840_vm11 = vcmp.lt.s32.totalorder %v461_v50, %v2017_v5 }
  0xd3   : > { %v1405_v0 = vsel %vm840_vm11, %v272_v57, -inf }
  0xd4   : > { %v1571_v1 = vmax.f32 %v1388_v58, %v1570_v61  ;;  %v463_v58 = vadd.s32 936, %v2007_v2  ;;  %v273_v61 = vld [vmem:[%s2014_s3 + $0x3a0] sm:$0xff]  ;;  %vm841_vm12 = vcmp.lt.s32.totalorder %v462_v54, %v2017_v5 }
  0xd5   : > { %v1406_v6 = vsel %vm841_vm12, %v273_v61, -inf }
  0xd6   : > { %v1572_v7 = vmax.f32 %v1389_v62, %v1571_v1  ;;  %v464_v62 = vadd.s32 944, %v2007_v2  ;;  %v274_v1 = vld [vmem:[%s2014_s3 + $0x3a8] sm:$0xff]  ;;  %vm842_vm13 = vcmp.lt.s32.totalorder %v463_v58, %v2017_v5 }
  0xd7   : > { %v1407_v10 = vsel %vm842_vm13, %v274_v1, -inf }
  0xd8   : > { %v1573_v11 = vmax.f32 %v1390_v3, %v1572_v7  ;;  %v465_v3 = vadd.s32 952, %v2007_v2  ;;  %v275_v7 = vld [vmem:[%s2014_s3 + $0x3b0] sm:$0xff]  ;;  %vm843_vm14 = vcmp.lt.s32.totalorder %v464_v62, %v2017_v5 }
  0xd9   : > { %v1408_v14 = vsel %vm843_vm14, %v275_v7, -inf }
  0xda   : > { %v1574_v15 = vmax.f32 %v1391_v8, %v1573_v11  ;;  %v466_v8 = vadd.s32 960, %v2007_v2  ;;  %v276_v11 = vld [vmem:[%s2014_s3 + $0x3b8] sm:$0xff]  ;;  %vm844_vm15 = vcmp.lt.s32.totalorder %v465_v3, %v2017_v5 }
  0xdb   : > { %v1409_v18 = vsel %vm844_vm15, %v276_v11, -inf }
  0xdc   : > { %v1575_v19 = vmax.f32 %v1392_v12, %v1574_v15  ;;  %v467_v12 = vadd.s32 968, %v2007_v2  ;;  %v277_v15 = vld [vmem:[%s2014_s3 + $0x3c0] sm:$0xff]  ;;  %vm845_vm0 = vcmp.lt.s32.totalorder %v466_v8, %v2017_v5 }
  0xdd   : > { %v1410_v22 = vsel %vm845_vm0, %v277_v15, -inf }
  0xde   : > { %v1576_v23 = vmax.f32 %v1393_v16, %v1575_v19  ;;  %v468_v16 = vadd.s32 976, %v2007_v2  ;;  %v278_v19 = vld [vmem:[%s2014_s3 + $0x3c8] sm:$0xff]  ;;  %vm846_vm1 = vcmp.lt.s32.totalorder %v467_v12, %v2017_v5 }
  0xdf   : > { %v1411_v26 = vsel %vm846_vm1, %v278_v19, -inf }
  0xe0   : > { %v1577_v27 = vmax.f32 %v1394_v20, %v1576_v23  ;;  %v469_v20 = vadd.s32 984, %v2007_v2  ;;  %v279_v23 = vld [vmem:[%s2014_s3 + $0x3d0] sm:$0xff]  ;;  %vm847_vm2 = vcmp.lt.s32.totalorder %v468_v16, %v2017_v5 }
  0xe1   : > { %v1412_v30 = vsel %vm847_vm2, %v279_v23, -inf }
  0xe2   : > { %v1578_v31 = vmax.f32 %v1395_v24, %v1577_v27  ;;  %v470_v24 = vadd.s32 992, %v2007_v2  ;;  %v280_v27 = vld [vmem:[%s2014_s3 + $0x3d8] sm:$0xff]  ;;  %vm848_vm3 = vcmp.lt.s32.totalorder %v469_v20, %v2017_v5 }
  0xe3   : > { %v1413_v34 = vsel %vm848_vm3, %v280_v27, -inf }
  0xe4   : > { %v1579_v35 = vmax.f32 %v1396_v28, %v1578_v31  ;;  %v471_v28 = vadd.s32 1000, %v2007_v2  ;;  %v281_v31 = vld [vmem:[%s2014_s3 + $0x3e0] sm:$0xff]  ;;  %vm849_vm4 = vcmp.lt.s32.totalorder %v470_v24, %v2017_v5 }
  0xe5   : > { %v1414_v38 = vsel %vm849_vm4, %v281_v31, -inf }
  0xe6   : > { %v1580_v39 = vmax.f32 %v1397_v32, %v1579_v35  ;;  %v472_v32 = vadd.s32 1008, %v2007_v2  ;;  %v282_v35 = vld [vmem:[%s2014_s3 + $0x3e8] sm:$0xff]  ;;  %vm850_vm5 = vcmp.lt.s32.totalorder %v471_v28, %v2017_v5 }
  0xe7   : > { %v1415_v42 = vsel %vm850_vm5, %v282_v35, -inf }
  0xe8   : > { %v1581_v43 = vmax.f32 %v1398_v36, %v1580_v39  ;;  %v473_v36 = vadd.s32 1016, %v2007_v2  ;;  %v283_v39 = vld [vmem:[%s2014_s3 + $0x3f0] sm:$0xff]  ;;  %vm851_vm6 = vcmp.lt.s32.totalorder %v472_v32, %v2017_v5 }
  0xe9   : > { %v1416_v46 = vsel %vm851_vm6, %v283_v39, -inf }
  0xea   : > { %v1582_v47 = vmax.f32 %v1399_v40, %v1581_v43  ;;  %v474_v40 = vadd.s32 1024, %v2007_v2  ;;  %v284_v43 = vld [vmem:[%s2014_s3 + $0x3f8] sm:$0xff]  ;;  %vm852_vm7 = vcmp.lt.s32.totalorder %v473_v36, %v2017_v5 }
  0xeb   : > { %v1417_v50 = vsel %vm852_vm7, %v284_v43, -inf }
  0xec   : > { %v1583_v51 = vmax.f32 %v1400_v44, %v1582_v47  ;;  %v475_v44 = vadd.s32 1032, %v2007_v2  ;;  %v285_v47 = vld [vmem:[%s2014_s3 + $0x400] sm:$0xff]  ;;  %vm853_vm8 = vcmp.lt.s32.totalorder %v474_v40, %v2017_v5 }
  0xed   : > { %v1418_v54 = vsel %vm853_vm8, %v285_v47, -inf }
  0xee   : > { %v1584_v55 = vmax.f32 %v1401_v48, %v1583_v51  ;;  %v476_v48 = vadd.s32 1040, %v2007_v2  ;;  %v286_v51 = vld [vmem:[%s2014_s3 + $0x408] sm:$0xff]  ;;  %vm854_vm9 = vcmp.lt.s32.totalorder %v475_v44, %v2017_v5 }
  0xef   : > { %v1419_v58 = vsel %vm854_vm9, %v286_v51, -inf }
  0xf0   : > { %v1585_v59 = vmax.f32 %v1402_v52, %v1584_v55  ;;  %v477_v52 = vadd.s32 1048, %v2007_v2  ;;  %v287_v55 = vld [vmem:[%s2014_s3 + $0x410] sm:$0xff]  ;;  %vm855_vm10 = vcmp.lt.s32.totalorder %v476_v48, %v2017_v5 }
  0xf1   : > { %v1420_v62 = vsel %vm855_vm10, %v287_v55, -inf }
  0xf2   : > { %v1586_v63 = vmax.f32 %v1403_v56, %v1585_v59  ;;  %v478_v56 = vadd.s32 1056, %v2007_v2  ;;  %v288_v59 = vld [vmem:[%s2014_s3 + $0x418] sm:$0xff]  ;;  %vm856_vm11 = vcmp.lt.s32.totalorder %v477_v52, %v2017_v5 }
  0xf3   : > { %v1421_v3 = vsel %vm856_vm11, %v288_v59, -inf }
  0xf4   : > { %v1587_v4 = vmax.f32 %v1404_v60, %v1586_v63  ;;  %v479_v60 = vadd.s32 1064, %v2007_v2  ;;  %v289_v63 = vld [vmem:[%s2014_s3 + $0x420] sm:$0xff]  ;;  %vm857_vm12 = vcmp.lt.s32.totalorder %v478_v56, %v2017_v5 }
  0xf5   : > { %v1422_v8 = vsel %vm857_vm12, %v289_v63, -inf }
  0xf6   : > { %v1588_v9 = vmax.f32 %v1405_v0, %v1587_v4  ;;  %v480_v0 = vadd.s32 1072, %v2007_v2  ;;  %v290_v4 = vld [vmem:[%s2014_s3 + $0x428] sm:$0xff]  ;;  %vm858_vm13 = vcmp.lt.s32.totalorder %v479_v60, %v2017_v5 }
  0xf7   : > { %v1423_v12 = vsel %vm858_vm13, %v290_v4, -inf }
  0xf8   : > { %v1589_v13 = vmax.f32 %v1406_v6, %v1588_v9  ;;  %v481_v6 = vadd.s32 1080, %v2007_v2  ;;  %v291_v9 = vld [vmem:[%s2014_s3 + $0x430] sm:$0xff]  ;;  %vm859_vm14 = vcmp.lt.s32.totalorder %v480_v0, %v2017_v5 }
  0xf9   : > { %v1424_v16 = vsel %vm859_vm14, %v291_v9, -inf }
  0xfa   : > { %v1590_v17 = vmax.f32 %v1407_v10, %v1589_v13  ;;  %v482_v10 = vadd.s32 1088, %v2007_v2  ;;  %v292_v13 = vld [vmem:[%s2014_s3 + $0x438] sm:$0xff]  ;;  %vm860_vm15 = vcmp.lt.s32.totalorder %v481_v6, %v2017_v5 }
  0xfb   : > { %v1425_v20 = vsel %vm860_vm15, %v292_v13, -inf }
  0xfc   : > { %v1591_v21 = vmax.f32 %v1408_v14, %v1590_v17  ;;  %v483_v14 = vadd.s32 1096, %v2007_v2  ;;  %v293_v17 = vld [vmem:[%s2014_s3 + $0x440] sm:$0xff]  ;;  %vm861_vm0 = vcmp.lt.s32.totalorder %v482_v10, %v2017_v5 }
  0xfd   : > { %v1426_v24 = vsel %vm861_vm0, %v293_v17, -inf }
  0xfe   : > { %v1592_v25 = vmax.f32 %v1409_v18, %v1591_v21  ;;  %v484_v18 = vadd.s32 1104, %v2007_v2  ;;  %v294_v21 = vld [vmem:[%s2014_s3 + $0x448] sm:$0xff]  ;;  %vm862_vm1 = vcmp.lt.s32.totalorder %v483_v14, %v2017_v5 }
  0xff   : > { %v1427_v28 = vsel %vm862_vm1, %v294_v21, -inf }
 0x100   : > { %v1593_v29 = vmax.f32 %v1410_v22, %v1592_v25  ;;  %v485_v22 = vadd.s32 1112, %v2007_v2  ;;  %v295_v25 = vld [vmem:[%s2014_s3 + $0x450] sm:$0xff]  ;;  %vm863_vm2 = vcmp.lt.s32.totalorder %v484_v18, %v2017_v5 }
 0x101   : > { %v1428_v32 = vsel %vm863_vm2, %v295_v25, -inf }
 0x102   : > { %v1594_v33 = vmax.f32 %v1411_v26, %v1593_v29  ;;  %v486_v26 = vadd.s32 1120, %v2007_v2  ;;  %v296_v29 = vld [vmem:[%s2014_s3 + $0x458] sm:$0xff]  ;;  %vm864_vm3 = vcmp.lt.s32.totalorder %v485_v22, %v2017_v5 }
 0x103   : > { %v1429_v36 = vsel %vm864_vm3, %v296_v29, -inf }
 0x104   : > { %v1595_v37 = vmax.f32 %v1412_v30, %v1594_v33  ;;  %v487_v30 = vadd.s32 1128, %v2007_v2  ;;  %v297_v33 = vld [vmem:[%s2014_s3 + $0x460] sm:$0xff]  ;;  %vm865_vm4 = vcmp.lt.s32.totalorder %v486_v26, %v2017_v5 }
 0x105   : > { %v1430_v40 = vsel %vm865_vm4, %v297_v33, -inf }
 0x106   : > { %v1596_v41 = vmax.f32 %v1413_v34, %v1595_v37  ;;  %v488_v34 = vadd.s32 1136, %v2007_v2  ;;  %v298_v37 = vld [vmem:[%s2014_s3 + $0x468] sm:$0xff]  ;;  %vm866_vm5 = vcmp.lt.s32.totalorder %v487_v30, %v2017_v5 }
 0x107   : > { %v1431_v44 = vsel %vm866_vm5, %v298_v37, -inf }
 0x108   : > { %v1597_v45 = vmax.f32 %v1414_v38, %v1596_v41  ;;  %v489_v38 = vadd.s32 1144, %v2007_v2  ;;  %v299_v41 = vld [vmem:[%s2014_s3 + $0x470] sm:$0xff]  ;;  %vm867_vm6 = vcmp.lt.s32.totalorder %v488_v34, %v2017_v5 }
 0x109   : > { %v1432_v48 = vsel %vm867_vm6, %v299_v41, -inf }
 0x10a   : > { %v1598_v49 = vmax.f32 %v1415_v42, %v1597_v45  ;;  %v490_v42 = vadd.s32 1152, %v2007_v2  ;;  %v300_v45 = vld [vmem:[%s2014_s3 + $0x478] sm:$0xff]  ;;  %vm868_vm7 = vcmp.lt.s32.totalorder %v489_v38, %v2017_v5 }
 0x10b   : > { %v1433_v52 = vsel %vm868_vm7, %v300_v45, -inf }
 0x10c   : > { %v1599_v53 = vmax.f32 %v1416_v46, %v1598_v49  ;;  %v491_v46 = vadd.s32 1160, %v2007_v2  ;;  %v301_v49 = vld [vmem:[%s2014_s3 + $0x480] sm:$0xff]  ;;  %vm869_vm8 = vcmp.lt.s32.totalorder %v490_v42, %v2017_v5 }
 0x10d   : > { %v1434_v56 = vsel %vm869_vm8, %v301_v49, -inf }
 0x10e   : > { %v1600_v57 = vmax.f32 %v1417_v50, %v1599_v53  ;;  %v492_v50 = vadd.s32 1168, %v2007_v2  ;;  %v302_v53 = vld [vmem:[%s2014_s3 + $0x488] sm:$0xff]  ;;  %vm870_vm9 = vcmp.lt.s32.totalorder %v491_v46, %v2017_v5 }
 0x10f   : > { %v1435_v60 = vsel %vm870_vm9, %v302_v53, -inf }
 0x110   : > { %v1601_v61 = vmax.f32 %v1418_v54, %v1600_v57  ;;  %v493_v54 = vadd.s32 1176, %v2007_v2  ;;  %v303_v57 = vld [vmem:[%s2014_s3 + $0x490] sm:$0xff]  ;;  %vm871_vm10 = vcmp.lt.s32.totalorder %v492_v50, %v2017_v5 }
 0x111   : > { %v1436_v0 = vsel %vm871_vm10, %v303_v57, -inf }
 0x112   : > { %v1602_v1 = vmax.f32 %v1419_v58, %v1601_v61  ;;  %v494_v58 = vadd.s32 1184, %v2007_v2  ;;  %v304_v61 = vld [vmem:[%s2014_s3 + $0x498] sm:$0xff]  ;;  %vm872_vm11 = vcmp.lt.s32.totalorder %v493_v54, %v2017_v5 }
 0x113   : > { %v1437_v6 = vsel %vm872_vm11, %v304_v61, -inf }
 0x114   : > { %v1603_v7 = vmax.f32 %v1420_v62, %v1602_v1  ;;  %v495_v62 = vadd.s32 1192, %v2007_v2  ;;  %v305_v1 = vld [vmem:[%s2014_s3 + $0x4a0] sm:$0xff]  ;;  %vm873_vm12 = vcmp.lt.s32.totalorder %v494_v58, %v2017_v5 }
 0x115   : > { %v1438_v10 = vsel %vm873_vm12, %v305_v1, -inf }
 0x116   : > { %v1604_v11 = vmax.f32 %v1421_v3, %v1603_v7  ;;  %v496_v3 = vadd.s32 1200, %v2007_v2  ;;  %v306_v7 = vld [vmem:[%s2014_s3 + $0x4a8] sm:$0xff]  ;;  %vm874_vm13 = vcmp.lt.s32.totalorder %v495_v62, %v2017_v5 }
 0x117   : > { %v1439_v14 = vsel %vm874_vm13, %v306_v7, -inf }
 0x118   : > { %v1605_v15 = vmax.f32 %v1422_v8, %v1604_v11  ;;  %v497_v8 = vadd.s32 1208, %v2007_v2  ;;  %v307_v11 = vld [vmem:[%s2014_s3 + $0x4b0] sm:$0xff]  ;;  %vm875_vm14 = vcmp.lt.s32.totalorder %v496_v3, %v2017_v5 }
 0x119   : > { %v1440_v18 = vsel %vm875_vm14, %v307_v11, -inf }
 0x11a   : > { %v1606_v19 = vmax.f32 %v1423_v12, %v1605_v15  ;;  %v498_v12 = vadd.s32 1216, %v2007_v2  ;;  %v308_v15 = vld [vmem:[%s2014_s3 + $0x4b8] sm:$0xff]  ;;  %vm876_vm15 = vcmp.lt.s32.totalorder %v497_v8, %v2017_v5 }
 0x11b   : > { %v1441_v22 = vsel %vm876_vm15, %v308_v15, -inf }
 0x11c   : > { %v1607_v23 = vmax.f32 %v1424_v16, %v1606_v19  ;;  %v499_v16 = vadd.s32 1224, %v2007_v2  ;;  %v309_v19 = vld [vmem:[%s2014_s3 + $0x4c0] sm:$0xff]  ;;  %vm877_vm0 = vcmp.lt.s32.totalorder %v498_v12, %v2017_v5 }
 0x11d   : > { %v1442_v26 = vsel %vm877_vm0, %v309_v19, -inf }
 0x11e   : > { %v1608_v27 = vmax.f32 %v1425_v20, %v1607_v23  ;;  %v500_v20 = vadd.s32 1232, %v2007_v2  ;;  %v310_v23 = vld [vmem:[%s2014_s3 + $0x4c8] sm:$0xff]  ;;  %vm878_vm1 = vcmp.lt.s32.totalorder %v499_v16, %v2017_v5 }
 0x11f   : > { %v1443_v30 = vsel %vm878_vm1, %v310_v23, -inf }
 0x120   : > { %v1609_v31 = vmax.f32 %v1426_v24, %v1608_v27  ;;  %v501_v24 = vadd.s32 1240, %v2007_v2  ;;  %v311_v27 = vld [vmem:[%s2014_s3 + $0x4d0] sm:$0xff]  ;;  %vm879_vm2 = vcmp.lt.s32.totalorder %v500_v20, %v2017_v5 }
 0x121   : > { %v1444_v34 = vsel %vm879_vm2, %v311_v27, -inf }
 0x122   : > { %v1610_v35 = vmax.f32 %v1427_v28, %v1609_v31  ;;  %v502_v28 = vadd.s32 1248, %v2007_v2  ;;  %v312_v31 = vld [vmem:[%s2014_s3 + $0x4d8] sm:$0xff]  ;;  %vm880_vm3 = vcmp.lt.s32.totalorder %v501_v24, %v2017_v5 }
 0x123   : > { %v1445_v38 = vsel %vm880_vm3, %v312_v31, -inf }
 0x124   : > { %v1611_v39 = vmax.f32 %v1428_v32, %v1610_v35  ;;  %v503_v32 = vadd.s32 1256, %v2007_v2  ;;  %v313_v35 = vld [vmem:[%s2014_s3 + $0x4e0] sm:$0xff]  ;;  %vm881_vm4 = vcmp.lt.s32.totalorder %v502_v28, %v2017_v5 }
 0x125   : > { %v1446_v42 = vsel %vm881_vm4, %v313_v35, -inf }
 0x126   : > { %v1612_v43 = vmax.f32 %v1429_v36, %v1611_v39  ;;  %v504_v36 = vadd.s32 1264, %v2007_v2  ;;  %v314_v39 = vld [vmem:[%s2014_s3 + $0x4e8] sm:$0xff]  ;;  %vm882_vm5 = vcmp.lt.s32.totalorder %v503_v32, %v2017_v5 }
 0x127   : > { %v1447_v46 = vsel %vm882_vm5, %v314_v39, -inf }
 0x128   : > { %v1613_v47 = vmax.f32 %v1430_v40, %v1612_v43  ;;  %v505_v40 = vadd.s32 1272, %v2007_v2  ;;  %v315_v43 = vld [vmem:[%s2014_s3 + $0x4f0] sm:$0xff]  ;;  %vm883_vm6 = vcmp.lt.s32.totalorder %v504_v36, %v2017_v5 }
 0x129   : > { %v1448_v50 = vsel %vm883_vm6, %v315_v43, -inf }
 0x12a   : > { %v1614_v51 = vmax.f32 %v1431_v44, %v1613_v47  ;;  %v506_v44 = vadd.s32 1280, %v2007_v2  ;;  %v316_v47 = vld [vmem:[%s2014_s3 + $0x4f8] sm:$0xff]  ;;  %vm884_vm7 = vcmp.lt.s32.totalorder %v505_v40, %v2017_v5 }
 0x12b   : > { %v1449_v54 = vsel %vm884_vm7, %v316_v47, -inf }
 0x12c   : > { %v1615_v55 = vmax.f32 %v1432_v48, %v1614_v51  ;;  %v507_v48 = vadd.s32 1288, %v2007_v2  ;;  %v317_v51 = vld [vmem:[%s2014_s3 + $0x500] sm:$0xff]  ;;  %vm885_vm8 = vcmp.lt.s32.totalorder %v506_v44, %v2017_v5 }
 0x12d   : > { %v1450_v58 = vsel %vm885_vm8, %v317_v51, -inf }
 0x12e   : > { %v1616_v59 = vmax.f32 %v1433_v52, %v1615_v55  ;;  %v508_v52 = vadd.s32 1296, %v2007_v2  ;;  %v318_v55 = vld [vmem:[%s2014_s3 + $0x508] sm:$0xff]  ;;  %vm886_vm9 = vcmp.lt.s32.totalorder %v507_v48, %v2017_v5 }
 0x12f   : > { %v1451_v62 = vsel %vm886_vm9, %v318_v55, -inf }
 0x130   : > { %v1617_v63 = vmax.f32 %v1434_v56, %v1616_v59  ;;  %v509_v56 = vadd.s32 1304, %v2007_v2  ;;  %v319_v59 = vld [vmem:[%s2014_s3 + $0x510] sm:$0xff]  ;;  %vm887_vm10 = vcmp.lt.s32.totalorder %v508_v52, %v2017_v5 }
 0x131   : > { %v1452_v3 = vsel %vm887_vm10, %v319_v59, -inf }
 0x132   : > { %v1618_v4 = vmax.f32 %v1435_v60, %v1617_v63  ;;  %v510_v60 = vadd.s32 1312, %v2007_v2  ;;  %v320_v63 = vld [vmem:[%s2014_s3 + $0x518] sm:$0xff]  ;;  %vm888_vm11 = vcmp.lt.s32.totalorder %v509_v56, %v2017_v5 }
 0x133   : > { %v1453_v8 = vsel %vm888_vm11, %v320_v63, -inf }
 0x134   : > { %v1619_v9 = vmax.f32 %v1436_v0, %v1618_v4  ;;  %v511_v0 = vadd.s32 1320, %v2007_v2  ;;  %v321_v4 = vld [vmem:[%s2014_s3 + $0x520] sm:$0xff]  ;;  %vm889_vm12 = vcmp.lt.s32.totalorder %v510_v60, %v2017_v5 }
 0x135   : > { %v1454_v12 = vsel %vm889_vm12, %v321_v4, -inf }
 0x136   : > { %v1620_v13 = vmax.f32 %v1437_v6, %v1619_v9  ;;  %v512_v6 = vadd.s32 1328, %v2007_v2  ;;  %v322_v9 = vld [vmem:[%s2014_s3 + $0x528] sm:$0xff]  ;;  %vm890_vm13 = vcmp.lt.s32.totalorder %v511_v0, %v2017_v5 }
 0x137   : > { %v1455_v16 = vsel %vm890_vm13, %v322_v9, -inf }
 0x138   : > { %v1621_v17 = vmax.f32 %v1438_v10, %v1620_v13  ;;  %v513_v10 = vadd.s32 1336, %v2007_v2  ;;  %v323_v13 = vld [vmem:[%s2014_s3 + $0x530] sm:$0xff]  ;;  %vm891_vm14 = vcmp.lt.s32.totalorder %v512_v6, %v2017_v5 }
 0x139   : > { %v1456_v20 = vsel %vm891_vm14, %v323_v13, -inf }
 0x13a   : > { %v1622_v21 = vmax.f32 %v1439_v14, %v1621_v17  ;;  %v514_v14 = vadd.s32 1344, %v2007_v2  ;;  %v324_v17 = vld [vmem:[%s2014_s3 + $0x538] sm:$0xff]  ;;  %vm892_vm15 = vcmp.lt.s32.totalorder %v513_v10, %v2017_v5 }
 0x13b   : > { %v1457_v24 = vsel %vm892_vm15, %v324_v17, -inf }
 0x13c   : > { %v1623_v25 = vmax.f32 %v1440_v18, %v1622_v21  ;;  %v515_v18 = vadd.s32 1352, %v2007_v2  ;;  %v325_v21 = vld [vmem:[%s2014_s3 + $0x540] sm:$0xff]  ;;  %vm893_vm0 = vcmp.lt.s32.totalorder %v514_v14, %v2017_v5 }
 0x13d   : > { %v1458_v28 = vsel %vm893_vm0, %v325_v21, -inf  ;;  %v531_v21 = vadd.s32 1480, %v2007_v2 }
 0x13e   : > { %v1624_v29 = vmax.f32 %v1441_v22, %v1623_v25  ;;  %v516_v22 = vadd.s32 1360, %v2007_v2  ;;  %v326_v25 = vld [vmem:[%s2014_s3 + $0x548] sm:$0xff]  ;;  %vm894_vm1 = vcmp.lt.s32.totalorder %v515_v18, %v2017_v5 }
 0x13f   : > { %v1459_v32 = vsel %vm894_vm1, %v326_v25, -inf  ;;  %v341_v25 = vld [vmem:[%s2014_s3 + $0x5c0] sm:$0xff]  ;;  %vm725_vm1 = vcmp.lt.s32.totalorder %v2007_v2, %v2017_v5 }
 0x140   : > { %v1625_v33 = vmax.f32 %v1442_v26, %v1624_v29  ;;  %v517_v26 = vadd.s32 1368, %v2007_v2  ;;  %v327_v29 = vld [vmem:[%s2014_s3 + $0x550] sm:$0xff]  ;;  %vm895_vm2 = vcmp.lt.s32.totalorder %v516_v22, %v2017_v5 }
 0x141   : > { %v1460_v36 = vsel %vm895_vm2, %v327_v29, -inf  ;;  %v348_v29 = vadd.s32 16, %v2007_v2 }
 0x142   : > { %v1626_v37 = vmax.f32 %v1443_v30, %v1625_v33  ;;  %v518_v30 = vadd.s32 1376, %v2007_v2  ;;  %v328_v33 = vld [vmem:[%s2014_s3 + $0x558] sm:$0xff]  ;;  %vm896_vm3 = vcmp.lt.s32.totalorder %v517_v26, %v2017_v5  ;;  %v351_v26 = vadd.s32 40, %v2007_v2 }
 0x143   : > { %v1461_v40 = vsel %vm896_vm3, %v328_v33, -inf  ;;  %v161_v33 = vld [vmem:[%s2014_s3 + $0x20] sm:$0xff]  ;;  %vm910_vm3 = vcmp.lt.s32.totalorder %v531_v21, %v2017_v5 }
 0x144   : > { %v1627_v41 = vmax.f32 %v1444_v34, %v1626_v37  ;;  %v519_v34 = vadd.s32 1384, %v2007_v2  ;;  %v329_v37 = vld [vmem:[%s2014_s3 + $0x560] sm:$0xff]  ;;  %vm897_vm4 = vcmp.lt.s32.totalorder %v518_v30, %v2017_v5  ;;  %v352_v30 = vadd.s32 48, %v2007_v2 }
 0x145   : > { %v1462_v44 = vsel %vm897_vm4, %v329_v37, -inf  ;;  %v353_v37 = vadd.s32 56, %v2007_v2 }
 0x146   : > { %v1628_v45 = vmax.f32 %v1445_v38, %v1627_v41  ;;  %v520_v38 = vadd.s32 1392, %v2007_v2  ;;  %v330_v41 = vld [vmem:[%s2014_s3 + $0x568] sm:$0xff]  ;;  %vm898_vm5 = vcmp.lt.s32.totalorder %v519_v34, %v2017_v5 }
 0x147   : > { %v1463_v48 = vsel %vm898_vm5, %v330_v41, -inf  ;;  %v342_v34 = vld [vmem:[%s2014_s3 + $0x5c8] sm:$0xff]  ;;  %v343_v41 = vld [vmem:[%s2014_s3 + $0x5d0] sm:$0xff]  ;;  %vm730_vm5 = vcmp.lt.s32.totalorder %v351_v26, %v2017_v5 }
 0x148   : > { %v1629_v49 = vmax.f32 %v1446_v42, %v1628_v45  ;;  %v521_v42 = vadd.s32 1400, %v2007_v2  ;;  %v331_v45 = vld [vmem:[%s2014_s3 + $0x570] sm:$0xff]  ;;  %vm899_vm6 = vcmp.lt.s32.totalorder %v520_v38, %v2017_v5 }
 0x149   : > { %v1464_v52 = vsel %vm899_vm6, %v331_v45, -inf  ;;  %v1475_v45 = vsel %vm910_vm3, %v342_v34, -inf }
 0x14a   : > { %v1630_v53 = vmax.f32 %v1447_v46, %v1629_v49  ;;  %v522_v46 = vadd.s32 1408, %v2007_v2  ;;  %v332_v49 = vld [vmem:[%s2014_s3 + $0x578] sm:$0xff]  ;;  %vm900_vm7 = vcmp.lt.s32.totalorder %v521_v42, %v2017_v5 }
 0x14b   : > { %v1465_v56 = vsel %vm900_vm7, %v332_v49, -inf  ;;  %vm727_vm7 = vcmp.lt.s32.totalorder %v348_v29, %v2017_v5  ;;  %v533_v49 = vadd.s32 1496, %v2007_v2 }
 0x14c   : > { %v1631_v57 = vmax.f32 %v1448_v50, %v1630_v53  ;;  %v523_v50 = vadd.s32 1416, %v2007_v2  ;;  %v333_v53 = vld [vmem:[%s2014_s3 + $0x580] sm:$0xff]  ;;  %vm901_vm8 = vcmp.lt.s32.totalorder %v522_v46, %v2017_v5  ;;  %v159_v46 = vld [vmem:[%s2014_s3 + $0x10] sm:$0xff] }
 0x14d   : > { %v1466_v60 = vsel %vm901_vm8, %v333_v53, -inf  ;;  %vm731_vm8 = vcmp.lt.s32.totalorder %v352_v30, %v2017_v5  ;;  %v160_v53 = vld [vmem:[%s2014_s3 + $0x18] sm:$0xff] }
 0x14e   : > { %v1632_v61 = vmax.f32 %v1449_v54, %v1631_v57  ;;  %v524_v54 = vadd.s32 1424, %v2007_v2  ;;  %v334_v57 = vld [vmem:[%s2014_s3 + $0x588] sm:$0xff]  ;;  %vm902_vm9 = vcmp.lt.s32.totalorder %v523_v50, %v2017_v5 }
 0x14f   : > { %v1467_v0 = vsel %vm902_vm9, %v334_v57, -inf  ;;  %v1292_v57 = vsel %vm727_vm7, %v159_v46, -inf }
 0x150   : > { %v1633_v1 = vmax.f32 %v1450_v58, %v1632_v61  ;;  %v525_v58 = vadd.s32 1432, %v2007_v2  ;;  %v335_v61 = vld [vmem:[%s2014_s3 + $0x590] sm:$0xff]  ;;  %vm903_vm10 = vcmp.lt.s32.totalorder %v524_v54, %v2017_v5  ;;  %v164_v54 = vld [vmem:[%s2014_s3 + $0x38] sm:$0xff] }
 0x151   : > { %v1468_v6 = vsel %vm903_vm10, %v335_v61, -inf  ;;  %vm732_vm10 = vcmp.lt.s32.totalorder %v353_v37, %v2017_v5  ;;  %v344_v61 = vld [vmem:[%s2014_s3 + $0x5d8] sm:$0xf] }
 0x152   : > { %v1634_v7 = vmax.f32 %v1451_v62, %v1633_v1  ;;  %v526_v62 = vadd.s32 1440, %v2007_v2  ;;  %v336_v1 = vld [vmem:[%s2014_s3 + $0x598] sm:$0xff]  ;;  %vm904_vm11 = vcmp.lt.s32.totalorder %v525_v58, %v2017_v5 }
 0x153   : > { %v1469_v10 = vsel %vm904_vm11, %v336_v1, -inf  ;;  %vm912_vm11 = vcmp.lt.s32.totalorder %v533_v49, %v2017_v5 }
 0x154   : > { %v1635_v11 = vmax.f32 %v1452_v3, %v1634_v7  ;;  %v527_v3 = vadd.s32 1448, %v2007_v2  ;;  %v337_v7 = vld [vmem:[%s2014_s3 + $0x5a0] sm:$0xff]  ;;  %vm905_vm12 = vcmp.lt.s32.totalorder %v526_v62, %v2017_v5  ;;  %v1477_v1 = vsel %vm912_vm11, %v344_v61, -inf }
 0x155   : > { %v1470_v14 = vsel %vm905_vm12, %v337_v7, -inf  ;;  %vm1661_vm12 = vcmask 1043456  }
 0x156   : > { %v1636_v15 = vmax.f32 %v1453_v8, %v1635_v11  ;;  %v528_v8 = vadd.s32 1456, %v2007_v2  ;;  %v338_v11 = vld [vmem:[%s2014_s3 + $0x5a8] sm:$0xff]  ;;  %vm906_vm13 = vcmp.lt.s32.totalorder %v527_v3, %v2017_v5  ;;  %v1662_v7 = vsel %vm1661_vm12, %v1477_v1, -inf }
 0x157   : > { %v1471_v18 = vsel %vm906_vm13, %v338_v11, -inf }
 0x158   : > { %v1637_v19 = vmax.f32 %v1454_v12, %v1636_v15  ;;  %v529_v12 = vadd.s32 1464, %v2007_v2  ;;  %v339_v15 = vld [vmem:[%s2014_s3 + $0x5b0] sm:$0xff]  ;;  %vm907_vm14 = vcmp.lt.s32.totalorder %v528_v8, %v2017_v5 }
 0x15a   : > { %v1638_v23 = vmax.f32 %v1455_v16, %v1637_v19  ;;  %v530_v16 = vadd.s32 1472, %v2007_v2  ;;  %v340_v19 = vld [vmem:[%s2014_s3 + $0x5b8] sm:$0xff]  ;;  %vm908_vm15 = vcmp.lt.s32.totalorder %v529_v12, %v2017_v5 }
 0x15c   : > { %v1639_v27 = vmax.f32 %v1456_v20, %v1638_v23  ;;  %v350_v20 = vadd.s32 32, %v2007_v2  ;;  %v347_v23 = vadd.s32 8, %v2007_v2  ;;  %vm909_vm0 = vcmp.lt.s32.totalorder %v530_v16, %v2017_v5 }
 0x15d   : > { %v1474_v38 = vsel %vm909_vm0, %v341_v25, -inf }
 0x15e   : > { %v1640_v31 = vmax.f32 %v1457_v24, %v1639_v27  ;;  %v1472_v24 = vsel %vm907_vm14, %v339_v15, -inf  ;;  %v532_v27 = vadd.s32 1488, %v2007_v2  ;;  %vm729_vm2 = vcmp.lt.s32.totalorder %v350_v20, %v2017_v5 }
 0x15f   : > { %vm726_vm4 = vcmp.lt.s32.totalorder %v347_v23, %v2017_v5 }
 0x160   : > { %v1641_v35 = vmax.f32 %v1458_v28, %v1640_v31  ;;  %v1473_v31 = vsel %vm908_vm15, %v340_v19, -inf  ;;  %vm911_vm6 = vcmp.lt.s32.totalorder %v532_v27, %v2017_v5 }
 0x162   : > { %v1642_v39 = vmax.f32 %v1459_v32, %v1641_v35  ;;  %v157_v32 = vld [vmem:[%s2014_s3] sm:$0xff] }
 0x164   : > { %v1643_v43 = vmax.f32 %v1460_v36, %v1642_v39  ;;  %v349_v36 = vadd.s32 24, %v2007_v2  ;;  %v158_v39 = vld [vmem:[%s2014_s3 + $0x8] sm:$0xff]  ;;  %v1297_v2 = vsel %vm732_vm10, %v164_v54, -inf }
 0x165   : > { %v1291_v50 = vsel %vm726_vm4, %v158_v39, -inf }
 0x166   : > { %v1644_v47 = vmax.f32 %v1461_v40, %v1643_v43  ;;  %v162_v40 = vld [vmem:[%s2014_s3 + $0x28] sm:$0xff]  ;;  %v1290_v43 = vsel %vm725_vm1, %v157_v32, -inf  ;;  %vm728_vm9 = vcmp.lt.s32.totalorder %v349_v36, %v2017_v5 }
 0x167   : > { %v1293_v62 = vsel %vm728_vm9, %v160_v53, -inf }
 0x168   : > { %v1645_v51 = vmax.f32 %v1462_v44, %v1644_v47  ;;  %v1294_v44 = vsel %vm729_vm2, %v161_v33, -inf  ;;  %v163_v47 = vld [vmem:[%s2014_s3 + $0x30] sm:$0xff] }
 0x169   : > { %v1296_v58 = vsel %vm731_vm8, %v163_v47, -inf }
 0x16a   : > { %v1646_v55 = vmax.f32 %v1463_v48, %v1645_v51  ;;  %v1295_v51 = vsel %vm730_vm5, %v162_v40, -inf }
 0x16c   : > { %v1647_v59 = vmax.f32 %v1464_v52, %v1646_v55  ;;  %v1476_v52 = vsel %vm911_vm6, %v343_v41, -inf }
 0x16e   : > { %v1648_v63 = vmax.f32 %v1465_v56, %v1647_v59  ;;  %v1478_v56 = vmax.f32 %v1290_v43, %v1294_v44 }
 0x170   : > { %v1649_v4 = vmax.f32 %v1466_v60, %v1648_v63  ;;  %v1479_v60 = vmax.f32 %v1291_v50, %v1295_v51 }
 0x172   : > { %v1650_v9 = vmax.f32 %v1467_v0, %v1649_v4  ;;  %v1480_v0 = vmax.f32 %v1292_v57, %v1296_v58  ;;  %v1481_v4 = vmax.f32 %v1293_v62, %v1297_v2 }
 0x174   : > { %v1651_v13 = vmax.f32 %v1468_v6, %v1650_v9 }
 0x176   : > { %v1652_v17 = vmax.f32 %v1469_v10, %v1651_v13 }
 0x178   : > { %v1653_v22 = vmax.f32 %v1470_v14, %v1652_v17  ;;  %v913_v14 = vld [vmem:[#allocation2] sm:$0x1]  ;;  %v1681_v17 = vstv %s1680_s5 }
 0x179   : > { %vm1682_vm13 = vcmp.eq.s32.totalorder %v1681_v17, 1 }
 0x17a   : > { %v1654_v28 = vmax.f32 %v1471_v18, %v1653_v22 }
 0x17c   : > { %v1655_v35 = vmax.f32 %v1472_v24, %v1654_v28 }
 0x17e   : > { %v1656_v42 = vmax.f32 %v1473_v31, %v1655_v35 }
 0x180   : > { %v1657_v48 = vmax.f32 %v1474_v38, %v1656_v42 }
 0x182   : > { %v1658_v55 = vmax.f32 %v1475_v45, %v1657_v48 }
 0x184   : > { %v1659_v59 = vmax.f32 %v1476_v52, %v1658_v55 }
 0x186   : > { %v1660_v63 = vmax.f32 %v1478_v56, %v1659_v59 }
 0x188   : > { %v1663_v3 = vmax.f32 %v1479_v60, %v1660_v63 }
 0x18a   : > { %v1664_v6 = vmax.f32 %v1480_v0, %v1663_v3 }
 0x18c   : > { %v1665_v8 = vmax.f32 %v1481_v4, %v1664_v6 }
 0x18e   : > { %v1666_v9 = vmax.f32 %v1662_v7, %v1665_v8 }
 0x190   : > { %v1667_v10 = vrot.slane %v1666_v9, 4 }
 0x192   : > { %v1668_v11 = vmax.f32 %v1666_v9, %v1667_v10 }
 0x194   : > { %v1669_v12 = vrot.slane %v1668_v11, 2 }
 0x196   : > { %v1670_v13 = vmax.f32 %v1668_v11, %v1669_v12 }
 0x198   : > { %v1671_v5 = vrot.slane %v1670_v13, 1 }
 0x19a   : > { %v1672_v15 = vmax.f32 %v1670_v13, %v1671_v5 }
 0x19c   : > { %v1673_v16 = vmax.f32 %v913_v14, %v1672_v15 }
 0x19e   : > { %1674 = vst [vmem:[#allocation2] sm:$0x1] %v1673_v16 }
 0x1a5   : > { %v1678_v18 = vld [vmem:[#allocation2] sm:$0x1] }
 0x1a6   : > { %v1683_v19 = vsel %vm1682_vm13, %v1678_v18, 0.0 }
 0x1a7   : > { %1684 = vst [vmem:[%s140_s9] sm:$0x1] %v1683_v19 }
 0x1a8   : > { %1872 = shalt.err (!%p1869_p6)
}
 0x1a9   : > { %1776 = dma.vmem_to_hbm [thread:$0]  (%p1987_p4), %s1697_s10, 16, %s1699_s11, %s1686_s12  }
 0x1aa PF: > { %p1782_p7 = scmp.ge.s32.totalorder %s1925_s18, 2  ;;  %s1710_s28 = sand.u32 1, %s1905_s13  }
 0x1ab   : > { %s1711_s29 = scalar_lea.sflag [#allocation6], %s1710_s28 }
 0x1ac   : > { %p1779_p9 = pnand %p1782_p7, %p1994_p8 }
 0x1ae   : > { %p1780_p10 = pneg %p1779_p9 }
 0x1b0   : > { %1900 = dma.done.wait (%p1780_p10), %s1711_s29, 16  }
 0x1b1   : > { %1902 = vsyncadd (%p1780_p10), %s1711_s29, 4294967280  ;;  %s23_s18 = sadd.s32 1, %s1925_s18   ;;  %s2624_s13 = smov %s1909_s14 }
 0x1b2   : > { %p20_p11 = scmp.ge.s32.totalorder %s23_s18, 4   ;;  %s2625_s14 = smov %s1913_s15 }
 0x1b3   : > { %s2626_s15 = smov %s2000_s25  ;;  %s2627_s16 = smov %s1921_s17 }
 0x1b4   : > { %s2628_s17 = smov %s2630_s20  ;;  %22 = sbr.rel (!%p20_p11) target bundleno = 10 (0xa), region = 67 }
 0x1b9   :  { %1716 = vsyncpa [#allocation6], 1 }
 0x1ba   :  { %1718 = vsyncpa [#allocation6 + $0x1], 1 }

</bundles_post_ra>
